<compile_context>
chip_gen: v7x
topology: tpu7x:2x2x1
jax: 0.10.0
libtpu: 0.0.40
codegen_flags: <defaults>
</compile_context>

<pallas_src>
import functools

import numpy as np

import jax
import jax.numpy as jnp
from jax import lax
from jax.experimental import pallas as pl
from jax.experimental.pallas import tpu as pltpu

HIDDEN = 16     # hidden_dim / embed_dim
NODE_DIM = 2    # node_dim
FFH = 16        # feed_forward_hidden
N_HEADS = 1
LN_EPS = 1e-5


# --------------------------- constant tables (numpy, cached) -------------------

def _sinusoidal_pe_np(n_pos, dim):
    pos = np.arange(n_pos, dtype=np.float32)[:, None]
    i = np.arange(0, dim, 2, dtype=np.float32)
    div = np.exp(-np.log(10000.0) * i / dim)
    pe = np.zeros((n_pos, dim), np.float32)
    pe[:, 0::2] = np.sin(pos * div)
    pe[:, 1::2] = np.cos(pos * div)
    return pe


@functools.lru_cache(maxsize=None)
def _build_constants(p, d, h=HIDDEN):
    """Constants in dimension-major token order (token n -> dim n//p, individual n%p)."""
    n = p * d
    rep = np.zeros((n, p), np.float32)        # rep[dd*p+pp, pp] = 1   (replicate pop rows per dim)
    dmask = np.zeros((n, d), np.float32)      # dmask[dd*p+pp, dd] = 1 (select xs[:, dd] per dim block)
    mean_mat = np.zeros((p, n), np.float32)   # mean over the D axis per individual
    for dd in range(d):
        for pp in range(p):
            tok = dd * p + pp
            rep[tok, pp] = 1.0
            dmask[tok, dd] = 1.0
            mean_mat[pp, tok] = 1.0 / d

    neg = np.float32(-1e9)
    tok = np.arange(n)
    grp_dim = tok // p                        # tokens sharing a dimension
    grp_ind = tok % p                         # tokens sharing an individual
    mb_d = np.where(grp_dim[:, None] == grp_dim[None, :], 0.0, neg).astype(np.float32)
    mb_i = np.where(grp_ind[:, None] == grp_ind[None, :], 0.0, neg).astype(np.float32)

    pe = _sinusoidal_pe_np(d, h)              # (D, H)
    pe_half = (0.5 * np.repeat(pe, p, axis=0)).astype(np.float32)   # row dd*p+pp -> 0.5*PE[dd]
    return pe_half, rep, dmask, mean_mat, mb_d, mb_i


@functools.lru_cache(maxsize=None)
def _slab_layout(p, d, h=HIDDEN, ffh=FFH):
    """Row offsets (8-aligned) of every section inside the single packed f32 slab."""
    n = p * d
    width = max(3 * h, h, ffh, n, p, d)
    sections = [
        ("vec", 15),                                   # 15 x (1, <=max(h,ffh)) vectors
        ("d_wqkv", h), ("d_w1", h), ("d_w2", ffh),
        ("i_wqkv", h), ("i_w1", h), ("i_w2", ffh),
        ("pe", n), ("rep", n), ("dmask", n), ("mean", p),
        ("mbias_d", n), ("mbias_i", n),
    ]
    offs, cur = {}, 0
    for name, rows in sections:
        offs[name] = cur
        cur += ((rows + 7) // 8) * 8
    return offs, cur, width


def pack_slab(params, p, d):
    """Host-side, one-time packing of all params + constants into one f32 slab.

    Folds applied here (to weights/constants only, never to runtime inputs):
      Wq *= 1/sqrt(dk);  Wv <- Wv @ Wo;  PE <- 0.5 * PE.
    """
    h, ffh = HIDDEN, FFH
    offs, total, width = _slab_layout(p, d)
    slab = np.zeros((total, width), np.float32)

    def put(name, a):
        a = np.asarray(a, np.float32)
        r0 = offs[name]
        slab[r0:r0 + a.shape[0], 0:a.shape[1]] = a

    vec = np.zeros((15, max(h, ffh)), np.float32)
    vec[0, :h] = np.asarray(params["emb_wx"], np.float32).reshape(-1)
    vec[1, :h] = np.asarray(params["emb_wy"], np.float32).reshape(-1)
    vec[2, :h] = np.asarray(params["emb_b"], np.float32).reshape(-1)

    def fold_enc(prm, base):
        wqkv, wo, g1, be1, w1, b1, w2, b2, g2, be2 = (np.asarray(t, np.float32) for t in prm)
        vec[base + 0, :h] = g1.reshape(-1)
        vec[base + 1, :h] = be1.reshape(-1)
        vec[base + 2, :ffh] = b1.reshape(-1)
        vec[base + 3, :h] = b2.reshape(-1)
        vec[base + 4, :h] = g2.reshape(-1)
        vec[base + 5, :h] = be2.reshape(-1)
        wq = wqkv[:, 0:h] * np.float32(1.0 / np.sqrt(h // N_HEADS))   # fold attention scale
        wk = wqkv[:, h:2 * h]
        wvo = wqkv[:, 2 * h:3 * h] @ wo                               # fold Wo into Wv
        return np.concatenate([wq, wk, wvo], axis=1), w1, w2

    d_wqkv, d_w1, d_w2 = fold_enc(params["dim_enc"], 3)
    i_wqkv, i_w1, i_w2 = fold_enc(params["ind_enc"], 9)

    put("vec", vec)
    put("d_wqkv", d_wqkv); put("d_w1", d_w1); put("d_w2", d_w2)
    put("i_wqkv", i_wqkv); put("i_w1", i_w1); put("i_w2", i_w2)

    pe_half, rep, dmask, mean_mat, mb_d, mb_i = _build_constants(p, d)
    put("pe", pe_half); put("rep", rep); put("dmask", dmask)
    put("mean", mean_mat); put("mbias_d", mb_d); put("mbias_i", mb_i)
    return jnp.asarray(slab)


# ------------------------------ kernel helpers --------------------------------

def _layer_norm(x, gamma, beta):
    mu = jnp.mean(x, axis=-1, keepdims=True)
    diff = x - mu
    var = jnp.mean(diff * diff, axis=-1, keepdims=True)
    return diff * lax.rsqrt(var + LN_EPS) * gamma + beta


def _encoder_block(x, wqkv, g1, be1, w1, b1, w2, b2, g2, be2, mask_bias):
    """Post-norm transformer block on a flat (N, H) token slab.

    wqkv already has the 1/sqrt(dk) scale folded into its Q columns and Wo folded
    into its V columns. Per-group attention is a single (N, N) score matmul plus a
    block-diagonal additive mask.
    """
    h = HIDDEN
    qkv = jnp.dot(x, wqkv, preferred_element_type=jnp.float32)        # (N, 3H)
    q = qkv[:, 0:h]
    k = qkv[:, h:2 * h]
    v = qkv[:, 2 * h:3 * h]                                           # = x @ (Wv @ Wo)

    scores = lax.dot_general(q, k, (((1,), (1,)), ((), ())),
                             preferred_element_type=jnp.float32)
    scores = scores + mask_bias
    scores = scores - jnp.max(scores, axis=-1, keepdims=True)
    e = jnp.exp(scores)
    # approx reciprocal runs on the EUP slot; ~1e-3 rel error on attention weights.
    attn = e * pl.reciprocal(jnp.sum(e, axis=-1, keepdims=True), approx=True)
    mha = jnp.dot(attn, v, preferred_element_type=jnp.float32)

    hn = _layer_norm(x + mha, g1, be1)
    ff = jnp.maximum(jnp.dot(hn, w1, preferred_element_type=jnp.float32) + b1, 0.0)
    ff = jnp.dot(ff, w2, preferred_element_type=jnp.float32) + b2
    return _layer_norm(hn + ff, g2, be2)


# ------------------------------ fused kernel ----------------------------------

def _make_kernel(p, d):
    h, ffh = HIDDEN, FFH
    n = p * d
    offs, _, _ = _slab_layout(p, d)
    vw = max(h, ffh)

    def kernel(xs_ref, ys_ref, slab_ref, o_ref):
        # ---- static slices of the single packed slab (no per-param DMAs) ----
        vec = slab_ref[offs["vec"]:offs["vec"] + 16, 0:vw]
        emb_wx, emb_wy, emb_b = vec[0:1, 0:h], vec[1:2, 0:h], vec[2:3, 0:h]
        d_g1, d_be1 = vec[3:4, 0:h], vec[4:5, 0:h]
        d_b1 = vec[5:6, 0:ffh]
        d_b2, d_g2, d_be2 = vec[6:7, 0:h], vec[7:8, 0:h], vec[8:9, 0:h]
        i_g1, i_be1 = vec[9:10, 0:h], vec[10:11, 0:h]
        i_b1 = vec[11:12, 0:ffh]
        i_b2, i_g2, i_be2 = vec[12:13, 0:h], vec[13:14, 0:h], vec[14:15, 0:h]

        d_wqkv = slab_ref[offs["d_wqkv"]:offs["d_wqkv"] + h, 0:3 * h]
        d_w1 = slab_ref[offs["d_w1"]:offs["d_w1"] + h, 0:ffh]
        d_w2 = slab_ref[offs["d_w2"]:offs["d_w2"] + ffh, 0:h]
        i_wqkv = slab_ref[offs["i_wqkv"]:offs["i_wqkv"] + h, 0:3 * h]
        i_w1 = slab_ref[offs["i_w1"]:offs["i_w1"] + h, 0:ffh]
        i_w2 = slab_ref[offs["i_w2"]:offs["i_w2"] + ffh, 0:h]
        pe = slab_ref[offs["pe"]:offs["pe"] + n, 0:h]                  # 0.5 already folded in
        rep = slab_ref[offs["rep"]:offs["rep"] + n, 0:p]
        dmask = slab_ref[offs["dmask"]:offs["dmask"] + n, 0:d]
        meanm = slab_ref[offs["mean"]:offs["mean"] + p, 0:n]
        mb_d = slab_ref[offs["mbias_d"]:offs["mbias_d"] + n, 0:n]
        mb_i = slab_ref[offs["mbias_i"]:offs["mbias_i"] + n, 0:n]

        # ---- y normalization over the population ----
        ys = ys_ref[...]                                               # (1, P)
        y_min = jnp.min(ys, axis=-1, keepdims=True)
        y_max = jnp.max(ys, axis=-1, keepdims=True)
        y_n = (ys - y_min) / (y_max - y_min + 1e-12)

        # ---- raw feature columns in dimension-major token order ----
        x_rep = jnp.dot(rep, xs_ref[...], preferred_element_type=jnp.float32)   # (N, D)
        x_col = jnp.sum(x_rep * dmask, axis=-1, keepdims=True)                  # (N, 1): xs[p, d]
        y_col = jnp.sum(rep * y_n, axis=-1, keepdims=True)                      # (N, 1): y_[p]

        # ---- EmbeddingNet: Linear(2 -> H) on the VPU ----
        h1 = (jnp.broadcast_to(x_col, (n, h)) * emb_wx
              + jnp.broadcast_to(y_col, (n, h)) * emb_wy + emb_b)               # (N, H)

        # ---- dimension encoder: attention across the population within each dim ----
        o1 = _encoder_block(h1, d_wqkv, d_g1, d_be1, d_w1, d_b1, d_w2, d_b2,
                            d_g2, d_be2, mb_d)

        # ---- no permute: stay dimension-major; add (pre-halved) PE ----
        o2 = o1 + pe

        # ---- individual encoder: attention across dims within each individual ----
        o3 = _encoder_block(o2, i_wqkv, i_g1, i_be1, i_w1, i_b1, i_w2, i_b2,
                            i_g2, i_be2, mb_i)

        # ---- mean over the dimension axis (constant matmul epilogue) ----
        o_ref[...] = jnp.dot(meanm, o3, preferred_element_type=jnp.float32)     # (P, H)

    return kernel


# ------------------------------- JAX wrappers -----------------------------------

@functools.lru_cache(maxsize=None)
def _make_batched_forward(batch, p, d):
    """Grid over problems; the packed slab stays VMEM-resident across grid steps."""
    offs, total, width = _slab_layout(p, d)
    kernel = _make_kernel(p, d)

    call = pl.pallas_call(
        kernel,
        grid=(batch,),
        in_specs=[
            pl.BlockSpec((None, p, d), lambda b: (b, 0, 0)),           # xs: streamed per problem
            pl.BlockSpec((None, 1, p), lambda b: (b, 0, 0)),           # ys: streamed per problem
            pl.BlockSpec((total, width), lambda b: (0, 0)),            # slab: resident for all b
        ],
        out_specs=pl.BlockSpec((None, p, HIDDEN), lambda b: (b, 0, 0)),
        out_shape=jax.ShapeDtypeStruct((batch, p, HIDDEN), jnp.float32),
        compiler_params=pltpu.CompilerParams(
            dimension_semantics=("parallel",)),                        # 2 TCs on v7x
    )

    def forward(xs_b, ys_b, slab):
        return call(xs_b.astype(jnp.float32),
                    ys_b.reshape(batch, 1, p).astype(jnp.float32),
                    slab)

    return jax.jit(forward)


def feature_extractor_forward(xs, ys, slab):
    """xs: (P, D), ys: (P,), slab: packed params/constants -> (1, P, HIDDEN)."""
    p, d = xs.shape
    return _make_batched_forward(1, p, d)(xs[None], ys[None], slab)


def feature_extractor_forward_batched(xs_b, ys_b, slab):
    """xs_b: (B, P, D), ys_b: (B, P) -> (B, P, HIDDEN)."""
    b, p, d = xs_b.shape
    return _make_batched_forward(b, p, d)(xs_b, ys_b, slab)


# ------------------------------ params & reference ------------------------------

def init_params(key):
    def w(k, shape, scale=0.1):
        return (jax.random.normal(k, shape) * scale).astype(jnp.float32)

    def enc_params(k):
        ks = jax.random.split(k, 6)
        wq, wk, wv = w(ks[0], (HIDDEN, HIDDEN)), w(ks[1], (HIDDEN, HIDDEN)), w(ks[2], (HIDDEN, HIDDEN))
        return (
            jnp.concatenate([wq, wk, wv], axis=1),     # Wqkv (H, 3H)  (unscaled / unfolded)
            w(ks[3], (HIDDEN, HIDDEN)),                # Wo
            jnp.ones((1, HIDDEN), jnp.float32),        # ln1 gamma
            jnp.zeros((1, HIDDEN), jnp.float32),       # ln1 beta
            w(ks[4], (HIDDEN, FFH)),                   # FFN W1
            jnp.zeros((1, FFH), jnp.float32),          # FFN b1
            w(ks[5], (FFH, HIDDEN)),                   # FFN W2
            jnp.zeros((1, HIDDEN), jnp.float32),       # FFN b2
            jnp.ones((1, HIDDEN), jnp.float32),        # ln2 gamma
            jnp.zeros((1, HIDDEN), jnp.float32),       # ln2 beta
        )

    k_emb, k_dim, k_ind = jax.random.split(key, 3)
    emb_w = (jax.random.normal(k_emb, (NODE_DIM, HIDDEN)) * 0.1).astype(jnp.float32)
    return {
        "emb_wx": emb_w[0:1, :],
        "emb_wy": emb_w[1:2, :],
        "emb_b": jnp.zeros((1, HIDDEN), jnp.float32),
        "dim_enc": enc_params(k_dim),
        "ind_enc": enc_params(k_ind),
    }


def _layer_norm_ref(x, g, b):
    mu = jnp.mean(x, axis=-1, keepdims=True)
    var = jnp.mean((x - mu) ** 2, axis=-1, keepdims=True)
    return (x - mu) * lax.rsqrt(var + LN_EPS) * g + b


def _encoder_ref(x, prm):
    wqkv, wo, g1, be1, w1, b1, w2, b2, g2, be2 = prm
    h = HIDDEN
    qkv = x @ wqkv
    q, k, v = qkv[..., :h], qkv[..., h:2 * h], qkv[..., 2 * h:]
    s = jnp.einsum('bqd,bkd->bqk', q, k) / jnp.sqrt(jnp.float32(h // N_HEADS))
    a = jax.nn.softmax(s, axis=-1)
    mha = jnp.einsum('bqk,bkd->bqd', a, v) @ wo
    hh = _layer_norm_ref(x + mha, g1, be1)
    ff = jax.nn.relu(hh @ w1 + b1) @ w2 + b2
    return _layer_norm_ref(hh + ff, g2, be2)


def reference_forward(xs, ys, params):
    """Pure-JAX reference with the same semantics (exact softmax, unfolded params)."""
    p, d = xs.shape
    y_ = (ys - ys.min()) / (ys.max() - ys.min() + 1e-12)              # (P,)
    h_ij = (xs.T[:, :, None] * params["emb_wx"][0][None, None, :]
            + y_[None, :, None] * params["emb_wy"][0][None, None, :]
            + params["emb_b"][0][None, None, :])                      # (D, P, H)
    o_ij = _encoder_ref(h_ij, params["dim_enc"])                      # (D, P, H)
    pe = jnp.asarray(_sinusoidal_pe_np(d, HIDDEN))
    o_i = jnp.transpose(o_ij, (1, 0, 2)) + 0.5 * pe[None, :, :]       # (P, D, H)
    out = _encoder_ref(o_i, params["ind_enc"])                        # (P, D, H)
    return jnp.mean(out, axis=1)[None, :, :]                          # (1, P, H)


# ---------------------------------- main ---------------------------------------

if __name__ == "__main__":
    key = jax.random.PRNGKey(0)
    k_params, k_xs, k_ys, k_bxs, k_bys = jax.random.split(key, 5)

    P, D = 8, 4  # population size, problem dimension
    xs = jax.random.normal(k_xs, (P, D), dtype=jnp.float32)
    ys = jax.random.normal(k_ys, (P,), dtype=jnp.float32)
    params = init_params(k_params)

    # one-time host-side packing of params + constants (fold scale / Wo / 0.5*PE here)
    slab = pack_slab(params, P, D)

    out = jax.block_until_ready(feature_extractor_forward(xs, ys, slab))
    assert out.shape == (1, P, HIDDEN), out.shape
    assert bool(jnp.all(jnp.isfinite(out)))

    ref = jax.block_until_ready(reference_forward(xs, ys, params))
    max_err = float(jnp.max(jnp.abs(out - ref)))
    assert max_err < 5e-2, f"max abs error vs reference: {max_err}"

    # batched path: grid over problems, slab VMEM-resident, batch axis parallel (v7x: 2 TCs)
    B = 3
    xs_b = jax.random.normal(k_bxs, (B, P, D), dtype=jnp.float32)
    ys_b = jax.random.normal(k_bys, (B, P), dtype=jnp.float32)
    out_b = jax.block_until_ready(feature_extractor_forward_batched(xs_b, ys_b, slab))
    assert out_b.shape == (B, P, HIDDEN), out_b.shape
    for b in range(B):
        ref_b = reference_forward(xs_b[b], ys_b[b], params)
        err_b = float(jnp.max(jnp.abs(out_b[b:b + 1] - ref_b)))
        assert err_b < 5e-2, f"batched max abs error (b={b}): {err_b}"

    print("KERNEL_OK")
</pallas_src>

<mosaic_0001>
module attributes {stable_mosaic.version = 11 : i64} {
  func.func @kernel(%arg0: i32, %arg1: memref<1x8x4xf32, #tpu.memory_space<vmem>>, %arg2: memref<1x1x8xf32, #tpu.memory_space<vmem>>, %arg3: memref<280x48xf32, #tpu.memory_space<vmem>>, %arg4: memref<1x8x16xf32, #tpu.memory_space<vmem>>) attributes {dimension_semantics = [#tpu.dimension_semantics<parallel>], iteration_bounds = array<i64: 1>, scalar_prefetch = 0 : i64, scratch_operands = 0 : i64, tpu.core_type = #tpu.core_type<tc>, window_params = [{transform_indices = @transform_0, window_bounds = array<i64: 1, 8, 4>}, {transform_indices = @transform_1, window_bounds = array<i64: 1, 1, 8>}, {pipeline_mode = #tpu.pipeline_mode<synchronous>, transform_indices = @transform_2, window_bounds = array<i64: 280, 48>}, {transform_indices = @transform_3, window_bounds = array<i64: 1, 8, 16>}]} {
    %c0 = arith.constant 0 : index
    %c0_0 = arith.constant 0 : index
    %0 = vector.load %arg3[%c0, %c0_0] : memref<280x48xf32, #tpu.memory_space<vmem>>, vector<16x16xf32>
    %1 = vector.extract_strided_slice %0 {offsets = [0, 0], sizes = [1, 16], strides = [1, 1]} : vector<16x16xf32> to vector<1x16xf32>
    %2 = vector.extract_strided_slice %0 {offsets = [1, 0], sizes = [1, 16], strides = [1, 1]} : vector<16x16xf32> to vector<1x16xf32>
    %3 = vector.extract_strided_slice %0 {offsets = [2, 0], sizes = [1, 16], strides = [1, 1]} : vector<16x16xf32> to vector<1x16xf32>
    %4 = vector.extract_strided_slice %0 {offsets = [3, 0], sizes = [1, 16], strides = [1, 1]} : vector<16x16xf32> to vector<1x16xf32>
    %5 = vector.extract_strided_slice %0 {offsets = [4, 0], sizes = [1, 16], strides = [1, 1]} : vector<16x16xf32> to vector<1x16xf32>
    %6 = vector.extract_strided_slice %0 {offsets = [5, 0], sizes = [1, 16], strides = [1, 1]} : vector<16x16xf32> to vector<1x16xf32>
    %7 = vector.extract_strided_slice %0 {offsets = [6, 0], sizes = [1, 16], strides = [1, 1]} : vector<16x16xf32> to vector<1x16xf32>
    %8 = vector.extract_strided_slice %0 {offsets = [7, 0], sizes = [1, 16], strides = [1, 1]} : vector<16x16xf32> to vector<1x16xf32>
    %9 = vector.extract_strided_slice %0 {offsets = [8, 0], sizes = [1, 16], strides = [1, 1]} : vector<16x16xf32> to vector<1x16xf32>
    %10 = vector.extract_strided_slice %0 {offsets = [9, 0], sizes = [1, 16], strides = [1, 1]} : vector<16x16xf32> to vector<1x16xf32>
    %11 = vector.extract_strided_slice %0 {offsets = [10, 0], sizes = [1, 16], strides = [1, 1]} : vector<16x16xf32> to vector<1x16xf32>
    %12 = vector.extract_strided_slice %0 {offsets = [11, 0], sizes = [1, 16], strides = [1, 1]} : vector<16x16xf32> to vector<1x16xf32>
    %13 = vector.extract_strided_slice %0 {offsets = [12, 0], sizes = [1, 16], strides = [1, 1]} : vector<16x16xf32> to vector<1x16xf32>
    %14 = vector.extract_strided_slice %0 {offsets = [13, 0], sizes = [1, 16], strides = [1, 1]} : vector<16x16xf32> to vector<1x16xf32>
    %15 = vector.extract_strided_slice %0 {offsets = [14, 0], sizes = [1, 16], strides = [1, 1]} : vector<16x16xf32> to vector<1x16xf32>
    %c16 = arith.constant 16 : index
    %c0_1 = arith.constant 0 : index
    %16 = vector.load %arg3[%c16, %c0_1] : memref<280x48xf32, #tpu.memory_space<vmem>>, vector<16x48xf32>
    %c32 = arith.constant 32 : index
    %c0_2 = arith.constant 0 : index
    %17 = vector.load %arg3[%c32, %c0_2] : memref<280x48xf32, #tpu.memory_space<vmem>>, vector<16x16xf32>
    %c48 = arith.constant 48 : index
    %c0_3 = arith.constant 0 : index
    %18 = vector.load %arg3[%c48, %c0_3] : memref<280x48xf32, #tpu.memory_space<vmem>>, vector<16x16xf32>
    %c64 = arith.constant 64 : index
    %c0_4 = arith.constant 0 : index
    %19 = vector.load %arg3[%c64, %c0_4] : memref<280x48xf32, #tpu.memory_space<vmem>>, vector<16x48xf32>
    %c80 = arith.constant 80 : index
    %c0_5 = arith.constant 0 : index
    %20 = vector.load %arg3[%c80, %c0_5] : memref<280x48xf32, #tpu.memory_space<vmem>>, vector<16x16xf32>
    %c96 = arith.constant 96 : index
    %c0_6 = arith.constant 0 : index
    %21 = vector.load %arg3[%c96, %c0_6] : memref<280x48xf32, #tpu.memory_space<vmem>>, vector<16x16xf32>
    %c112 = arith.constant 112 : index
    %c0_7 = arith.constant 0 : index
    %22 = vector.load %arg3[%c112, %c0_7] : memref<280x48xf32, #tpu.memory_space<vmem>>, vector<32x16xf32>
    %c144 = arith.constant 144 : index
    %c0_8 = arith.constant 0 : index
    %23 = vector.load %arg3[%c144, %c0_8] : memref<280x48xf32, #tpu.memory_space<vmem>>, vector<32x8xf32>
    %c176 = arith.constant 176 : index
    %c0_9 = arith.constant 0 : index
    %24 = vector.load %arg3[%c176, %c0_9] : memref<280x48xf32, #tpu.memory_space<vmem>>, vector<32x4xf32>
    %c208 = arith.constant 208 : index
    %c0_10 = arith.constant 0 : index
    %25 = vector.load %arg3[%c208, %c0_10] : memref<280x48xf32, #tpu.memory_space<vmem>>, vector<8x32xf32>
    %c216 = arith.constant 216 : index
    %c0_11 = arith.constant 0 : index
    %26 = vector.load %arg3[%c216, %c0_11] : memref<280x48xf32, #tpu.memory_space<vmem>>, vector<32x32xf32>
    %c248 = arith.constant 248 : index
    %c0_12 = arith.constant 0 : index
    %27 = vector.load %arg3[%c248, %c0_12] : memref<280x48xf32, #tpu.memory_space<vmem>>, vector<32x32xf32>
    %c0_13 = arith.constant 0 : index
    %c0_14 = arith.constant 0 : index
    %c0_15 = arith.constant 0 : index
    %28 = vector.load %arg2[%c0_13, %c0_14, %c0_15] : memref<1x1x8xf32, #tpu.memory_space<vmem>>, vector<1x1x8xf32>
    %29 = vector.shape_cast %28 : vector<1x1x8xf32> to vector<1x8xf32>
    %cst = arith.constant dense<0x7F800000> : vector<1xf32>
    %30 = vector.multi_reduction <minimumf>, %29, %cst [1] : vector<1x8xf32> to vector<1xf32>
    %31 = vector.shape_cast %30 : vector<1xf32> to vector<1x1xf32>
    %cst_16 = arith.constant dense<0xFF800000> : vector<1xf32>
    %32 = vector.multi_reduction <maximumf>, %29, %cst_16 [1] : vector<1x8xf32> to vector<1xf32>
    %33 = vector.shape_cast %32 : vector<1xf32> to vector<1x1xf32>
    %34 = vector.broadcast %31 : vector<1x1xf32> to vector<1x8xf32>
    %35 = arith.subf %29, %34 : vector<1x8xf32>
    %36 = arith.subf %33, %31 : vector<1x1xf32>
    %cst_17 = arith.constant 9.99999996E-13 : f32
    %37 = vector.broadcast %cst_17 : f32 to vector<1x1xf32>
    %38 = arith.addf %36, %37 : vector<1x1xf32>
    %39 = vector.broadcast %38 : vector<1x1xf32> to vector<1x8xf32>
    %40 = arith.divf %35, %39 : vector<1x8xf32>
    %c0_18 = arith.constant 0 : index
    %c0_19 = arith.constant 0 : index
    %c0_20 = arith.constant 0 : index
    %41 = vector.load %arg1[%c0_18, %c0_19, %c0_20] : memref<1x8x4xf32, #tpu.memory_space<vmem>>, vector<1x8x4xf32>
    %42 = vector.shape_cast %41 : vector<1x8x4xf32> to vector<8x4xf32>
    %cst_21 = arith.constant dense<0.000000e+00> : vector<32x4xf32>
    %43 = tpu.matmul %23, %42, %cst_21 {dimension_numbers = #tpu.dot_dimension_numbers<[1], [0], [0], [1], [0, 0, 1, 1], [], []>} : vector<32x8xf32>, vector<8x4xf32>, vector<32x4xf32> -> vector<32x4xf32>
    %44 = arith.mulf %43, %24 : vector<32x4xf32>
    %cst_22 = arith.constant dense<0.000000e+00> : vector<32xf32>
    %45 = vector.multi_reduction <add>, %44, %cst_22 [1] : vector<32x4xf32> to vector<32xf32>
    %46 = vector.shape_cast %45 : vector<32xf32> to vector<32x1xf32>
    %47 = vector.broadcast %40 : vector<1x8xf32> to vector<32x8xf32>
    %48 = arith.mulf %23, %47 : vector<32x8xf32>
    %cst_23 = arith.constant dense<0.000000e+00> : vector<32xf32>
    %49 = vector.multi_reduction <add>, %48, %cst_23 [1] : vector<32x8xf32> to vector<32xf32>
    %50 = vector.shape_cast %49 : vector<32xf32> to vector<32x1xf32>
    %51 = vector.shape_cast %46 : vector<32x1xf32> to vector<32x1xf32>
    %52 = vector.broadcast %51 : vector<32x1xf32> to vector<32x16xf32>
    %53 = vector.broadcast %1 : vector<1x16xf32> to vector<32x16xf32>
    %54 = arith.mulf %52, %53 : vector<32x16xf32>
    %55 = vector.shape_cast %50 : vector<32x1xf32> to vector<32x1xf32>
    %56 = vector.broadcast %55 : vector<32x1xf32> to vector<32x16xf32>
    %57 = vector.broadcast %2 : vector<1x16xf32> to vector<32x16xf32>
    %58 = arith.mulf %56, %57 : vector<32x16xf32>
    %59 = arith.addf %54, %58 : vector<32x16xf32>
    %60 = vector.broadcast %3 : vector<1x16xf32> to vector<32x16xf32>
    %61 = arith.addf %59, %60 : vector<32x16xf32>
    %cst_24 = arith.constant dense<0.000000e+00> : vector<32x48xf32>
    %62 = tpu.matmul %61, %16, %cst_24 {dimension_numbers = #tpu.dot_dimension_numbers<[1], [0], [0], [1], [0, 0, 1, 1], [], []>} : vector<32x16xf32>, vector<16x48xf32>, vector<32x48xf32> -> vector<32x48xf32>
    %63 = vector.extract_strided_slice %62 {offsets = [0, 0], sizes = [32, 16], strides = [1, 1]} : vector<32x48xf32> to vector<32x16xf32>
    %64 = vector.extract_strided_slice %62 {offsets = [0, 16], sizes = [32, 16], strides = [1, 1]} : vector<32x48xf32> to vector<32x16xf32>
    %65 = vector.extract_strided_slice %62 {offsets = [0, 32], sizes = [32, 16], strides = [1, 1]} : vector<32x48xf32> to vector<32x16xf32>
    %cst_25 = arith.constant dense<0.000000e+00> : vector<32x32xf32>
    %66 = tpu.matmul %63, %64, %cst_25 {dimension_numbers = #tpu.dot_dimension_numbers<[1], [1], [0], [0], [0, 0, 1, 0], [], []>} : vector<32x16xf32>, vector<32x16xf32>, vector<32x32xf32> -> vector<32x32xf32>
    %67 = arith.addf %66, %26 : vector<32x32xf32>
    %cst_26 = arith.constant dense<0xFF800000> : vector<32xf32>
    %68 = vector.multi_reduction <maximumf>, %67, %cst_26 [1] : vector<32x32xf32> to vector<32xf32>
    %69 = vector.shape_cast %68 : vector<32xf32> to vector<32x1xf32>
    %70 = vector.broadcast %69 : vector<32x1xf32> to vector<32x32xf32>
    %71 = arith.subf %67, %70 : vector<32x32xf32>
    %72 = math.exp %71 : vector<32x32xf32>
    %cst_27 = arith.constant dense<0.000000e+00> : vector<32xf32>
    %73 = vector.multi_reduction <add>, %72, %cst_27 [1] : vector<32x32xf32> to vector<32xf32>
    %74 = vector.shape_cast %73 : vector<32xf32> to vector<32x1xf32>
    %75 = tpu.reciprocal %74 {approx = true} : vector<32x1xf32> -> vector<32x1xf32>
    %76 = vector.broadcast %75 : vector<32x1xf32> to vector<32x32xf32>
    %77 = arith.mulf %72, %76 : vector<32x32xf32>
    %cst_28 = arith.constant dense<0.000000e+00> : vector<32x16xf32>
    %78 = tpu.matmul %77, %65, %cst_28 {dimension_numbers = #tpu.dot_dimension_numbers<[1], [0], [0], [1], [0, 0, 1, 1], [], []>} : vector<32x32xf32>, vector<32x16xf32>, vector<32x16xf32> -> vector<32x16xf32>
    %79 = arith.addf %61, %78 : vector<32x16xf32>
    %cst_29 = arith.constant dense<0.000000e+00> : vector<32xf32>
    %80 = vector.multi_reduction <add>, %79, %cst_29 [1] : vector<32x16xf32> to vector<32xf32>
    %81 = vector.shape_cast %80 : vector<32xf32> to vector<32x1xf32>
    %cst_30 = arith.constant 1.600000e+01 : f32
    %82 = vector.broadcast %cst_30 : f32 to vector<32x1xf32>
    %83 = arith.divf %81, %82 : vector<32x1xf32>
    %84 = vector.broadcast %83 : vector<32x1xf32> to vector<32x16xf32>
    %85 = arith.subf %79, %84 : vector<32x16xf32>
    %86 = arith.mulf %85, %85 : vector<32x16xf32>
    %cst_31 = arith.constant dense<0.000000e+00> : vector<32xf32>
    %87 = vector.multi_reduction <add>, %86, %cst_31 [1] : vector<32x16xf32> to vector<32xf32>
    %88 = vector.shape_cast %87 : vector<32xf32> to vector<32x1xf32>
    %cst_32 = arith.constant 1.600000e+01 : f32
    %89 = vector.broadcast %cst_32 : f32 to vector<32x1xf32>
    %90 = arith.divf %88, %89 : vector<32x1xf32>
    %cst_33 = arith.constant 9.99999974E-6 : f32
    %91 = vector.broadcast %cst_33 : f32 to vector<32x1xf32>
    %92 = arith.addf %90, %91 : vector<32x1xf32>
    %93 = math.rsqrt %92 : vector<32x1xf32>
    %94 = vector.broadcast %93 : vector<32x1xf32> to vector<32x16xf32>
    %95 = arith.mulf %85, %94 : vector<32x16xf32>
    %96 = vector.broadcast %4 : vector<1x16xf32> to vector<32x16xf32>
    %97 = arith.mulf %95, %96 : vector<32x16xf32>
    %98 = vector.broadcast %5 : vector<1x16xf32> to vector<32x16xf32>
    %99 = arith.addf %97, %98 : vector<32x16xf32>
    %cst_34 = arith.constant dense<0.000000e+00> : vector<32x16xf32>
    %100 = tpu.matmul %99, %17, %cst_34 {dimension_numbers = #tpu.dot_dimension_numbers<[1], [0], [0], [1], [0, 0, 1, 1], [], []>} : vector<32x16xf32>, vector<16x16xf32>, vector<32x16xf32> -> vector<32x16xf32>
    %101 = vector.broadcast %6 : vector<1x16xf32> to vector<32x16xf32>
    %102 = arith.addf %100, %101 : vector<32x16xf32>
    %cst_35 = arith.constant 0.000000e+00 : f32
    %103 = vector.broadcast %cst_35 : f32 to vector<32x16xf32>
    %104 = arith.maximumf %102, %103 : vector<32x16xf32>
    %cst_36 = arith.constant dense<0.000000e+00> : vector<32x16xf32>
    %105 = tpu.matmul %104, %18, %cst_36 {dimension_numbers = #tpu.dot_dimension_numbers<[1], [0], [0], [1], [0, 0, 1, 1], [], []>} : vector<32x16xf32>, vector<16x16xf32>, vector<32x16xf32> -> vector<32x16xf32>
    %106 = vector.broadcast %7 : vector<1x16xf32> to vector<32x16xf32>
    %107 = arith.addf %105, %106 : vector<32x16xf32>
    %108 = arith.addf %99, %107 : vector<32x16xf32>
    %cst_37 = arith.constant dense<0.000000e+00> : vector<32xf32>
    %109 = vector.multi_reduction <add>, %108, %cst_37 [1] : vector<32x16xf32> to vector<32xf32>
    %110 = vector.shape_cast %109 : vector<32xf32> to vector<32x1xf32>
    %cst_38 = arith.constant 1.600000e+01 : f32
    %111 = vector.broadcast %cst_38 : f32 to vector<32x1xf32>
    %112 = arith.divf %110, %111 : vector<32x1xf32>
    %113 = vector.broadcast %112 : vector<32x1xf32> to vector<32x16xf32>
    %114 = arith.subf %108, %113 : vector<32x16xf32>
    %115 = arith.mulf %114, %114 : vector<32x16xf32>
    %cst_39 = arith.constant dense<0.000000e+00> : vector<32xf32>
    %116 = vector.multi_reduction <add>, %115, %cst_39 [1] : vector<32x16xf32> to vector<32xf32>
    %117 = vector.shape_cast %116 : vector<32xf32> to vector<32x1xf32>
    %cst_40 = arith.constant 1.600000e+01 : f32
    %118 = vector.broadcast %cst_40 : f32 to vector<32x1xf32>
    %119 = arith.divf %117, %118 : vector<32x1xf32>
    %cst_41 = arith.constant 9.99999974E-6 : f32
    %120 = vector.broadcast %cst_41 : f32 to vector<32x1xf32>
    %121 = arith.addf %119, %120 : vector<32x1xf32>
    %122 = math.rsqrt %121 : vector<32x1xf32>
    %123 = vector.broadcast %122 : vector<32x1xf32> to vector<32x16xf32>
    %124 = arith.mulf %114, %123 : vector<32x16xf32>
    %125 = vector.broadcast %8 : vector<1x16xf32> to vector<32x16xf32>
    %126 = arith.mulf %124, %125 : vector<32x16xf32>
    %127 = vector.broadcast %9 : vector<1x16xf32> to vector<32x16xf32>
    %128 = arith.addf %126, %127 : vector<32x16xf32>
    %129 = arith.addf %128, %22 : vector<32x16xf32>
    %cst_42 = arith.constant dense<0.000000e+00> : vector<32x48xf32>
    %130 = tpu.matmul %129, %19, %cst_42 {dimension_numbers = #tpu.dot_dimension_numbers<[1], [0], [0], [1], [0, 0, 1, 1], [], []>} : vector<32x16xf32>, vector<16x48xf32>, vector<32x48xf32> -> vector<32x48xf32>
    %131 = vector.extract_strided_slice %130 {offsets = [0, 0], sizes = [32, 16], strides = [1, 1]} : vector<32x48xf32> to vector<32x16xf32>
    %132 = vector.extract_strided_slice %130 {offsets = [0, 16], sizes = [32, 16], strides = [1, 1]} : vector<32x48xf32> to vector<32x16xf32>
    %133 = vector.extract_strided_slice %130 {offsets = [0, 32], sizes = [32, 16], strides = [1, 1]} : vector<32x48xf32> to vector<32x16xf32>
    %cst_43 = arith.constant dense<0.000000e+00> : vector<32x32xf32>
    %134 = tpu.matmul %131, %132, %cst_43 {dimension_numbers = #tpu.dot_dimension_numbers<[1], [1], [0], [0], [0, 0, 1, 0], [], []>} : vector<32x16xf32>, vector<32x16xf32>, vector<32x32xf32> -> vector<32x32xf32>
    %135 = arith.addf %134, %27 : vector<32x32xf32>
    %cst_44 = arith.constant dense<0xFF800000> : vector<32xf32>
    %136 = vector.multi_reduction <maximumf>, %135, %cst_44 [1] : vector<32x32xf32> to vector<32xf32>
    %137 = vector.shape_cast %136 : vector<32xf32> to vector<32x1xf32>
    %138 = vector.broadcast %137 : vector<32x1xf32> to vector<32x32xf32>
    %139 = arith.subf %135, %138 : vector<32x32xf32>
    %140 = math.exp %139 : vector<32x32xf32>
    %cst_45 = arith.constant dense<0.000000e+00> : vector<32xf32>
    %141 = vector.multi_reduction <add>, %140, %cst_45 [1] : vector<32x32xf32> to vector<32xf32>
    %142 = vector.shape_cast %141 : vector<32xf32> to vector<32x1xf32>
    %143 = tpu.reciprocal %142 {approx = true} : vector<32x1xf32> -> vector<32x1xf32>
    %144 = vector.broadcast %143 : vector<32x1xf32> to vector<32x32xf32>
    %145 = arith.mulf %140, %144 : vector<32x32xf32>
    %cst_46 = arith.constant dense<0.000000e+00> : vector<32x16xf32>
    %146 = tpu.matmul %145, %133, %cst_46 {dimension_numbers = #tpu.dot_dimension_numbers<[1], [0], [0], [1], [0, 0, 1, 1], [], []>} : vector<32x32xf32>, vector<32x16xf32>, vector<32x16xf32> -> vector<32x16xf32>
    %147 = arith.addf %129, %146 : vector<32x16xf32>
    %cst_47 = arith.constant dense<0.000000e+00> : vector<32xf32>
    %148 = vector.multi_reduction <add>, %147, %cst_47 [1] : vector<32x16xf32> to vector<32xf32>
    %149 = vector.shape_cast %148 : vector<32xf32> to vector<32x1xf32>
    %cst_48 = arith.constant 1.600000e+01 : f32
    %150 = vector.broadcast %cst_48 : f32 to vector<32x1xf32>
    %151 = arith.divf %149, %150 : vector<32x1xf32>
    %152 = vector.broadcast %151 : vector<32x1xf32> to vector<32x16xf32>
    %153 = arith.subf %147, %152 : vector<32x16xf32>
    %154 = arith.mulf %153, %153 : vector<32x16xf32>
    %cst_49 = arith.constant dense<0.000000e+00> : vector<32xf32>
    %155 = vector.multi_reduction <add>, %154, %cst_49 [1] : vector<32x16xf32> to vector<32xf32>
    %156 = vector.shape_cast %155 : vector<32xf32> to vector<32x1xf32>
    %cst_50 = arith.constant 1.600000e+01 : f32
    %157 = vector.broadcast %cst_50 : f32 to vector<32x1xf32>
    %158 = arith.divf %156, %157 : vector<32x1xf32>
    %cst_51 = arith.constant 9.99999974E-6 : f32
    %159 = vector.broadcast %cst_51 : f32 to vector<32x1xf32>
    %160 = arith.addf %158, %159 : vector<32x1xf32>
    %161 = math.rsqrt %160 : vector<32x1xf32>
    %162 = vector.broadcast %161 : vector<32x1xf32> to vector<32x16xf32>
    %163 = arith.mulf %153, %162 : vector<32x16xf32>
    %164 = vector.broadcast %10 : vector<1x16xf32> to vector<32x16xf32>
    %165 = arith.mulf %163, %164 : vector<32x16xf32>
    %166 = vector.broadcast %11 : vector<1x16xf32> to vector<32x16xf32>
    %167 = arith.addf %165, %166 : vector<32x16xf32>
    %cst_52 = arith.constant dense<0.000000e+00> : vector<32x16xf32>
    %168 = tpu.matmul %167, %20, %cst_52 {dimension_numbers = #tpu.dot_dimension_numbers<[1], [0], [0], [1], [0, 0, 1, 1], [], []>} : vector<32x16xf32>, vector<16x16xf32>, vector<32x16xf32> -> vector<32x16xf32>
    %169 = vector.broadcast %12 : vector<1x16xf32> to vector<32x16xf32>
    %170 = arith.addf %168, %169 : vector<32x16xf32>
    %cst_53 = arith.constant 0.000000e+00 : f32
    %171 = vector.broadcast %cst_53 : f32 to vector<32x16xf32>
    %172 = arith.maximumf %170, %171 : vector<32x16xf32>
    %cst_54 = arith.constant dense<0.000000e+00> : vector<32x16xf32>
    %173 = tpu.matmul %172, %21, %cst_54 {dimension_numbers = #tpu.dot_dimension_numbers<[1], [0], [0], [1], [0, 0, 1, 1], [], []>} : vector<32x16xf32>, vector<16x16xf32>, vector<32x16xf32> -> vector<32x16xf32>
    %174 = vector.broadcast %13 : vector<1x16xf32> to vector<32x16xf32>
    %175 = arith.addf %173, %174 : vector<32x16xf32>
    %176 = arith.addf %167, %175 : vector<32x16xf32>
    %cst_55 = arith.constant dense<0.000000e+00> : vector<32xf32>
    %177 = vector.multi_reduction <add>, %176, %cst_55 [1] : vector<32x16xf32> to vector<32xf32>
    %178 = vector.shape_cast %177 : vector<32xf32> to vector<32x1xf32>
    %cst_56 = arith.constant 1.600000e+01 : f32
    %179 = vector.broadcast %cst_56 : f32 to vector<32x1xf32>
    %180 = arith.divf %178, %179 : vector<32x1xf32>
    %181 = vector.broadcast %180 : vector<32x1xf32> to vector<32x16xf32>
    %182 = arith.subf %176, %181 : vector<32x16xf32>
    %183 = arith.mulf %182, %182 : vector<32x16xf32>
    %cst_57 = arith.constant dense<0.000000e+00> : vector<32xf32>
    %184 = vector.multi_reduction <add>, %183, %cst_57 [1] : vector<32x16xf32> to vector<32xf32>
    %185 = vector.shape_cast %184 : vector<32xf32> to vector<32x1xf32>
    %cst_58 = arith.constant 1.600000e+01 : f32
    %186 = vector.broadcast %cst_58 : f32 to vector<32x1xf32>
    %187 = arith.divf %185, %186 : vector<32x1xf32>
    %cst_59 = arith.constant 9.99999974E-6 : f32
    %188 = vector.broadcast %cst_59 : f32 to vector<32x1xf32>
    %189 = arith.addf %187, %188 : vector<32x1xf32>
    %190 = math.rsqrt %189 : vector<32x1xf32>
    %191 = vector.broadcast %190 : vector<32x1xf32> to vector<32x16xf32>
    %192 = arith.mulf %182, %191 : vector<32x16xf32>
    %193 = vector.broadcast %14 : vector<1x16xf32> to vector<32x16xf32>
    %194 = arith.mulf %192, %193 : vector<32x16xf32>
    %195 = vector.broadcast %15 : vector<1x16xf32> to vector<32x16xf32>
    %196 = arith.addf %194, %195 : vector<32x16xf32>
    %cst_60 = arith.constant dense<0.000000e+00> : vector<8x16xf32>
    %197 = tpu.matmul %25, %196, %cst_60 {dimension_numbers = #tpu.dot_dimension_numbers<[1], [0], [0], [1], [0, 0, 1, 1], [], []>} : vector<8x32xf32>, vector<32x16xf32>, vector<8x16xf32> -> vector<8x16xf32>
    %c0_61 = arith.constant 0 : index
    %c0_62 = arith.constant 0 : index
    %c0_63 = arith.constant 0 : index
    %198 = vector.load %arg4[%c0_61, %c0_62, %c0_63] : memref<1x8x16xf32, #tpu.memory_space<vmem>>, vector<1x8x16xf32>
    %199 = vector.shape_cast %198 : vector<1x8x16xf32> to vector<8x16xf32>
    %200 = vector.shape_cast %197 : vector<8x16xf32> to vector<1x8x16xf32>
    tpu.vector_store %arg4[%c0_61, %c0_62, %c0_63], %200 {strides = array<i32>} : memref<1x8x16xf32, #tpu.memory_space<vmem>>, vector<1x8x16xf32>,
    return
  }
  func.func @transform_0(%arg0: i32) -> (i32, i32, i32) {
    %c0_i32 = arith.constant 0 : i32
    %c0_i32_0 = arith.constant 0 : i32
    %c0_i32_1 = arith.constant 0 : i32
    return %arg0, %c0_i32, %c0_i32_0 : i32, i32, i32
  }
  func.func @transform_1(%arg0: i32) -> (i32, i32, i32) {
    %c0_i32 = arith.constant 0 : i32
    %c0_i32_0 = arith.constant 0 : i32
    %c0_i32_1 = arith.constant 0 : i32
    return %arg0, %c0_i32, %c0_i32_0 : i32, i32, i32
  }
  func.func @transform_2(%arg0: i32) -> (i32, i32) {
    %c0_i32 = arith.constant 0 : i32
    %c0_i32_0 = arith.constant 0 : i32
    %c0_i32_1 = arith.constant 0 : i32
    return %c0_i32, %c0_i32_0 : i32, i32
  }
  func.func @transform_3(%arg0: i32) -> (i32, i32, i32) {
    %c0_i32 = arith.constant 0 : i32
    %c0_i32_0 = arith.constant 0 : i32
    %c0_i32_1 = arith.constant 0 : i32
    return %arg0, %c0_i32, %c0_i32_0 : i32, i32, i32
  }
}

</mosaic_0001>

<bundles_post_ra>
// kernel: forward.1
= control target key start
LH: loop header
LB: loop body
LE: loop exit
PB: predicated region body
PF: predicated region fallthrough
CT: control target
= control target key end

     0   :  { %vm64_vm0 = vcmask 64512   ;;  %vm51_vm1 = vcmask 57344   ;;  %s2609_s0 = inlined_call_operand.vmem [shape: f32[1,8,4], index: 0, kind: input, shape index: {}]   ;;  %s2610_s1 = inlined_call_operand.vmem [shape: f32[1,1,8], index: 1, kind: input, shape index: {}]   ;;  %s2611_s2 = inlined_call_operand.vmem [shape: f32[280,48], index: 2, kind: input, shape index: {}]   ;;  %s2612_s3 = inlined_call_operand.hbm [shape: f32[1,8,16], index: 3, kind: output, shape index: {}]  }
   0x1   :  { %v63_v0 = vld [vmem:[%s2609_s0] sm:$0xff]  ;;  %v33_v1 = vld [vmem:[%s2611_s2 + $0x90] sm:$0xff]  ;;  %v34_v2 = vld [vmem:[%s2611_s2 + $0x98] sm:$0xff] }
   0x2   :  { %1881 = vmatprep.subr.mxu0 %v63_v0  ;;  %1883 = vmatprep.mubr.msk.f32.mxu0 %vm64_vm0, %v33_v1  ;;  %v35_v3 = vld [vmem:[%s2611_s2 + $0xa0] sm:$0xff] }
   0x3   :  { %v50_v4 = vld [vmem:[%s2610_s1] sm:$0x1]  ;;  %1882 = vmatpush3.msra.mxu0 %v63_v0 }
   0x4   :  { %v52_v5 = vsel %vm51_vm1, %v50_v4, inf }
   0x5   :  { %8 = vsyncpa [#allocation3], 0  ;;  %1884 = vmatmul.mubr.msk.f32.vlgmr.msra.gmra.mrb[0].mxu0 %vm64_vm0, %v34_v2  ;;  %53 = vmin.xlane.f32.xlu0 %v52_v5  ;;  %v36_v6 = vld [vmem:[%s2611_s2 + $0xa8] sm:$0xff]  ;;  %v55_v7 = vsel %vm51_vm1, %v50_v4, -inf  ;;  %v180_v12 = vlaneseq  ;;  %v38_v21 = vld [vmem:[%s2611_s2 + $0xb8] sm:$0xff]  ;;  %vm166_vm2 = vcmask 31744  }
   0x6   :  { %1886 = vmatprep.mubr.msk.f32.mxu0 %vm64_vm0, %v35_v3  ;;  %v37_v22 = vld [vmem:[%s2611_s2 + $0xb0] sm:$0xff]  ;;  %v40_v28 = vld [vmem:[%s2611_s2 + $0xc8] sm:$0xff]  ;;  %v39_v29 = vld [vmem:[%s2611_s2 + $0xc0] sm:$0xff]  ;;  %vm229_vm3 = vcmask 130048   ;;  %s2222_s9 = smov 112   ;;  %vm440_vm5 = vcmask 261120  }
   0x7   :  { %v2270_v13 = vshrl.u32 %v180_v12, 7  ;;  %v17_v43 = vld [vmem:[%s2611_s2 + $0x10] sm:$0xff]  ;;  %v18_v44 = vld [vmem:[%s2611_s2 + $0x18] sm:$0xff]  ;;  %v2306_v47 = vld [vmem:[%s2611_s2] sm:$0xff]  ;;  %s2223_s18 = smov 96   ;;  %vm2225_vm6 = vmmov 0  }
   0x8   :  { %v2016_v45 = vpack.c.bf16 %v18_v44, %v17_v43  ;;  %vm2344_vm4 = vmpackc.low %vm229_vm3, %vm229_vm3  ;;  %s2227_s28 = smov [#allocation2]  }
   0x9   :  { %1887 = vmatmul.mubr.msk.f32.gmra.mrb[2].mxu0 %vm64_vm0, %v36_v6  ;;  %56 = vmax.xlane.f32.xlu0 %v55_v7  ;;  %v2273_v15 = vsub.s32 0, %v2270_v13  ;;  %v211_v46 = vsub.s32 1, %v2270_v13  ;;  %v223_v51 = vsub.s32 2, %v2270_v13  ;;  %s1742_s29 = sshll.u32 %s2227_s28, 4  ;;  %s1743_s29 = int_to_ptr.vmem [resolvable:$true] %s1742_s29 }
   0xa   :  { %2017 = vmatprep.subr.bf16.mxu1 %v2016_v45  ;;  %s2198_s30 = scalar_lea.vmem %s1743_s29, 128  ;;  %p2203_p1 = scmp.lt.s32.totalorder %s1743_s29, %s1743_s29 }
   0xb   :  { %2019 = vmatpush3.bf16.msra.mxu1 %v2016_v45  ;;  %v212_v49 = vrot.slane %v2306_v47, %v211_v46  ;;  %v204_v50 = vrot.slane %v2306_v47, %v2273_v15  ;;  %v224_v56 = vrot.slane %v2306_v47, %v223_v51  ;;  %p2199_p0 = scmp.ne.s32.totalorder %s1743_s29, %s2198_s30  ;;  %p2204_p2 = scmp.lt.s32.totalorder %s2198_s30, %s2198_s30 }
   0xd   :  { %p2205_p3 = por %p2204_p2, %p2203_p1 }
   0xf   :  { %p2206_p4 = pnand %p2205_p3, %p2199_p0 }
  0x92   :  { %v54_v8 = vpop.xlane.xlu0 %53 }
  0x93   :  { %v58_v14 = vsub.f32 %v50_v4, %v54_v8 }
  0x96   :  { %v57_v9 = vpop.xlane.xlu0 %56 }
  0x97   :  { %v59_v10 = vsub.f32 %v57_v9, %v54_v8 }
  0x99   :  { %v60_v11 = vadd.f32 1e-12, %v59_v10 }
  0x9b   :  { %2132 = vrcp.f32 %v60_v11 }
  0xa5   :  { %v2133_v16 = vpop.eup %2132 }
  0xa6   :  { %v62_v17 = vmul.f32 %v2133_v16, %v58_v14 }
  0xa8   :  { %v183_v18 = vrot.slane %v62_v17, %v2273_v15 }
  0xaa   :  { %v185_v19 = vmul.f32 %v183_v18, %v33_v1  ;;  %v186_v32 = vmul.f32 %v183_v18, %v34_v2  ;;  %v187_v38 = vmul.f32 %v183_v18, %v35_v3  ;;  %v188_v41 = vmul.f32 %v183_v18, %v36_v6 }
  0xac   :  { %v189_v20 = vsel %vm64_vm0, %v185_v19, 0.0  ;;  %v192_v36 = vsel %vm64_vm0, %v186_v32, 0.0  ;;  %v195_v40 = vsel %vm64_vm0, %v187_v38, 0.0  ;;  %v198_v42 = vsel %vm64_vm0, %v188_v41, 0.0 }
  0xad   :  { %190 = vadd.xlane.f32.xlu1 %v189_v20 }
  0xd8   :  { %v1885_v23 = vpop.f32.mrb[0].mxu0 }
  0xd9   :  { %v163_v24 = vmul.f32 %v1885_v23, %v38_v21  ;;  %v143_v25 = vpop.f32.mrb[1].mxu0  ;;  %v49_v23 = vld [vmem:[%s2611_s2 + $0x110] sm:$0xff] }
  0xda   :  { %v162_v26 = vmul.f32 %v143_v25, %v37_v22 }
  0xdb   :  { %v170_v27 = vsel %vm166_vm2, %v163_v24, 0.0 }
  0xdc   :  { %171 = vadd.xlane.f32.xlu0 %v170_v27  ;;  %v1888_v30 = vpop.f32.mrb[2].mxu0  ;;  %v167_v31 = vsel %vm166_vm2, %v162_v26, 0.0 }
  0xdd   :  { %168 = vadd.xlane.f32.xlu1 %v167_v31  ;;  %v153_v33 = vpop.f32.mrb[3].mxu0  ;;  %v165_v34 = vmul.f32 %v1888_v30, %v40_v28  ;;  %v42_v30 = vld [vmem:[%s2611_s2 + $0xd8] sm:$0xff] }
  0xde   :  { %v164_v35 = vmul.f32 %v153_v33, %v39_v29  ;;  %v43_v29 = vld [vmem:[%s2611_s2 + $0xe0] sm:$0xff] }
  0xdf   :  { %v176_v39 = vsel %vm166_vm2, %v165_v34, 0.0 }
  0xe0   :  { %v173_v37 = vsel %vm166_vm2, %v164_v35, 0.0  ;;  %v45_v35 = vld [vmem:[%s2611_s2 + $0xf0] sm:$0xff] }
  0xe1   :  { %193 = vadd.xlane.f32.xlu1 %v192_v36  ;;  %174 = vadd.xlane.f32.xlu0 %v173_v37  ;;  %v44_v37 = vld [vmem:[%s2611_s2 + $0xe8] sm:$0xff] }
  0xe5   :  { %196 = vadd.xlane.f32.xlu1 %v195_v40  ;;  %177 = vadd.xlane.f32.xlu0 %v176_v39 }
  0xe9   :  { %199 = vadd.xlane.f32.xlu1 %v198_v42 }
 0x13a   :  { %v191_v48 = vpop.xlane.xlu1 %190 }
 0x13b   :  { %v213_v54 = vmul.f32 %v212_v49, %v191_v48 }
 0x169   :  { %v172_v52 = vpop.xlane.xlu0 %171 }
 0x16a   :  { %v169_v53 = vpop.xlane.xlu1 %168  ;;  %v206_v60 = vmul.f32 %v204_v50, %v172_v52 }
 0x16b   :  { %v205_v55 = vmul.f32 %v204_v50, %v169_v53 }
 0x16d   :  { %v217_v57 = vadd.f32 %v213_v54, %v205_v55 }
 0x16e   :  { %v194_v58 = vpop.xlane.xlu1 %193  ;;  %v175_v59 = vpop.xlane.xlu0 %174 }
 0x16f   :  { %v214_v61 = vmul.f32 %v212_v49, %v194_v58  ;;  %v2317_v62 = vadd.f32 %v224_v56, %v217_v57  ;;  %v207_v0 = vmul.f32 %v204_v50, %v175_v59 }
 0x171   :  { %v218_v63 = vadd.f32 %v214_v61, %v206_v60  ;;  %1893 = vmatprep.mubr.msk.f32.mxu1 %vm229_vm3, %v2317_v62 }
 0x172   :  { %v197_v1 = vpop.xlane.xlu1 %196  ;;  %v178_v4 = vpop.xlane.xlu0 %177 }
 0x173   :  { %v2321_v2 = vadd.f32 %v224_v56, %v218_v63  ;;  %v215_v3 = vmul.f32 %v212_v49, %v197_v1  ;;  %v208_v8 = vmul.f32 %v204_v50, %v178_v4 }
 0x175   :  { %v219_v5 = vadd.f32 %v215_v3, %v207_v0  ;;  %1894 = vmatmul.mubr.msk.f32.vlgmr.msra.gmra.mrb[0].mxu1 %vm229_vm3, %v2321_v2 }
 0x176   :  { %v200_v6 = vpop.xlane.xlu1 %199 }
 0x177   :  { %v2325_v7 = vadd.f32 %v224_v56, %v219_v5  ;;  %v216_v9 = vmul.f32 %v212_v49, %v200_v6 }
 0x179   :  { %v220_v10 = vadd.f32 %v216_v9, %v208_v8  ;;  %1896 = vmatprep.mubr.msk.f32.mxu1 %vm229_vm3, %v2325_v7 }
 0x17b   :  { %v2329_v11 = vadd.f32 %v224_v56, %v220_v10 }
 0x17d   :  { %1897 = vmatmul.mubr.msk.f32.gmra.mrb[2].mxu1 %vm229_vm3, %v2329_v11 }
 0x248   :  { %v1895_v12 = vpop.f32.mrb[0].mxu1 }
 0x249   :  { %v308_v14 = vpop.f32.mrb[1].mxu1 }
 0x24a   :  { %v2333_v16 = vpack.i.bf16 %v1895_v12, %v308_v14  ;;  %1907 = vmatprep.mubr.msk.f32.mxu0 %vm229_vm3, %v308_v14 }
 0x24c   :  { %2093 = vrot.lane.b32.xlu0 %v2333_v16, %s2222_s9 }
 0x250   :  { %v1898_v17 = vpop.f32.mrb[2].mxu1 }
 0x251   :  { %v318_v18 = vpop.f32.mrb[3].mxu1 }
 0x252   :  { %v2338_v19 = vpack.i.bf16 %v1898_v17, %v318_v18 }
 0x254   :  { %2098 = vrot.lane.b32.xlu1 %v2338_v19, %s2222_s9 }
 0x2be   :  { %v2094_v20 = vpop.permute.xlu0 %2093 }
 0x2bf   :  { %v2096_v21 = vunpack.i.h.bf16 %v2094_v20  ;;  %v2095_v22 = vunpack.i.l.bf16 %v2094_v20 }
 0x2c1   :  { %v2020_v24 = vpack.c.bf16 %v2096_v21, %v2095_v22 }
 0x2c3   :  { %2022 = vmatprep.subr.msk.bf16.mxu0 %vm2344_vm4, %v2020_v24 }
 0x2c4   :  { %2025 = vmatpush3.bf16.xpose.msk.msra.mxu0 %vm2344_vm4, %v2020_v24 }
 0x2c6   :  { %v2099_v25 = vpop.permute.xlu1 %2098 }
 0x2c7   :  { %v2101_v26 = vunpack.i.h.bf16 %v2099_v25  ;;  %v2100_v27 = vunpack.i.l.bf16 %v2099_v25 }
 0x2c9   :  { %v2026_v28 = vpack.c.bf16 %v2101_v26, %v2100_v27 }
 0x2cb   :  { %2028 = vmatprep.subr.msk.bf16.mxu0 %vm2344_vm4, %v2026_v28 }
 0x2cc   :  { %2031 = vmatpush3.bf16.xpose.msk.msra.mxu0 %vm2344_vm4, %v2026_v28 }
 0x2d3   :  { %1908 = vmatmul.mubr.msk.f32.vlgmr.msra.gmra.mrb[4].mxu0 %vm229_vm3, %v1895_v12 }
 0x2d4   :  { %1910 = vmatprep.mubr.msk.f32.mxu0 %vm229_vm3, %v318_v18 }
 0x2d7   :  { %1911 = vmatmul.mubr.msk.f32.gmra.mrb[6].mxu0 %vm229_vm3, %v1898_v17 }
 0x3a6   :  { %v1909_v31 = vpop.f32.mrb[4].mxu0 }
 0x3a7   :  { %v427_v32 = vadd.f32 %v1909_v31, %v43_v29  ;;  %v421_v33 = vpop.f32.mrb[5].mxu0 }
 0x3a8   :  { %v422_v34 = vadd.f32 %v421_v33, %v42_v30 }
 0x3a9   :  { %v444_v36 = vsel %vm440_vm5, %v427_v32, -inf }
 0x3aa   :  { %445 = vmax.xlane.f32.xlu0 %v444_v36  ;;  %v1912_v38 = vpop.f32.mrb[6].mxu0  ;;  %v441_v39 = vsel %vm440_vm5, %v422_v34, -inf }
 0x3ab   :  { %v437_v40 = vadd.f32 %v1912_v38, %v45_v35  ;;  %v431_v41 = vpop.f32.mrb[7].mxu0  ;;  %442 = vmax.xlane.f32.xlu1 %v441_v39 }
 0x3ac   :  { %v432_v42 = vadd.f32 %v431_v41, %v44_v37 }
 0x3ad   :  { %v450_v43 = vsel %vm440_vm5, %v437_v40, -inf }
 0x3ae   :  { %v447_v44 = vsel %vm440_vm5, %v432_v42, -inf }
 0x3af   :  { %448 = vmax.xlane.f32.xlu0 %v447_v44  ;;  %451 = vmax.xlane.f32.xlu1 %v450_v43 }
 0x437   :  { %v446_v45 = vpop.xlane.xlu0 %445 }
 0x438   :  { %v454_v48 = vsub.f32 %v427_v32, %v446_v45  ;;  %v443_v49 = vpop.xlane.xlu1 %442 }
 0x439   :  { %v453_v50 = vsub.f32 %v422_v34, %v443_v49 }
 0x43a   :  { %v459_v52 = vmul.f32 1.442695, %v454_v48 }
 0x43b   :  { %v457_v53 = vmul.f32 1.442695, %v453_v50 }
 0x43c   :  { %2134 = vpow2.f32 %v459_v52  ;;  %v449_v54 = vpop.xlane.xlu0 %448  ;;  %v452_v55 = vpop.xlane.xlu1 %451 }
 0x43d   :  { %2136 = vpow2.f32 %v457_v53  ;;  %v455_v56 = vsub.f32 %v432_v42, %v449_v54  ;;  %v456_v57 = vsub.f32 %v437_v40, %v452_v55 }
 0x43f   :  { %v461_v58 = vmul.f32 1.442695, %v455_v56  ;;  %v463_v59 = vmul.f32 1.442695, %v456_v57 }
 0x441   :  { %2138 = vpow2.f32 %v461_v58 }
 0x442   :  { %2140 = vpow2.f32 %v463_v59 }
 0x446   :  { %v2135_v60 = vpop.eup %2134 }
 0x447   :  { %v2137_v61 = vpop.eup %2136  ;;  %v468_v63 = vsel %vm440_vm5, %v2135_v60, 0.0 }
 0x448   :  { %469 = vadd.xlane.f32.xlu1 %v468_v63  ;;  %v465_v0 = vsel %vm440_vm5, %v2137_v61, 0.0  ;;  %v19_v63 = vld [vmem:[%s2611_s2 + $0x20] sm:$0xff] }
 0x449   :  { %466 = vadd.xlane.f32.xlu0 %v465_v0  ;;  %v20_v0 = vld [vmem:[%s2611_s2 + $0x28] sm:$0xff] }
 0x44b   :  { %v2139_v1 = vpop.eup %2138 }
 0x44c   :  { %v2141_v3 = vpop.eup %2140  ;;  %v471_v4 = vsel %vm440_vm5, %v2139_v1, 0.0 }
 0x44d   :  { %472 = vadd.xlane.f32.xlu0 %v471_v4  ;;  %v474_v5 = vsel %vm440_vm5, %v2141_v3, 0.0  ;;  %v22_v4 = vld [vmem:[%s2611_s2 + $0x38] sm:$0xff] }
 0x44e   :  { %475 = vadd.xlane.f32.xlu1 %v474_v5 }
 0x45f   :  { %2108 = vrot.lane.b32.xlu1 %v2338_v19, %s2223_s18 }
 0x463   :  { %2103 = vrot.lane.b32.xlu0 %v2333_v16, %s2223_s18 }
 0x4d5   :  { %v470_v6 = vpop.xlane.xlu1 %469 }
 0x4d6   :  { %v467_v8 = vpop.xlane.xlu0 %466 }
 0x4d7   :  { %2142 = vrcp.f32 %v467_v8 }
 0x4d8   :  { %2144 = vrcp.f32 %v470_v6 }
 0x4da   :  { %v473_v9 = vpop.xlane.xlu0 %472 }
 0x4db   :  { %v476_v10 = vpop.xlane.xlu1 %475  ;;  %2146 = vrcp.f32 %v473_v9 }
 0x4dc   :  { %2148 = vrcp.f32 %v476_v10 }
 0x4de   :  { %v2104_v12 = vpop.permute.xlu0 %2103 }
 0x4df   :  { %v2106_v14 = vunpack.i.h.bf16 %v2104_v12  ;;  %v2105_v17 = vunpack.i.l.bf16 %v2104_v12  ;;  %v2109_v18 = vpop.permute.xlu1 %2108 }
 0x4e0   :  { %v2111_v20 = vunpack.i.h.bf16 %v2109_v18  ;;  %v2110_v21 = vunpack.i.l.bf16 %v2109_v18 }
 0x4e1   :  { %v2143_v22 = vpop.eup %2142  ;;  %v2032_v24 = vpack.c.bf16 %v2106_v14, %v2105_v17 }
 0x4e2   :  { %v481_v19 = vmul.f32 %v2143_v22, %v2137_v61  ;;  %v2036_v25 = vpack.c.bf16 %v2111_v20, %v2110_v21  ;;  %v2145_v16 = vpop.eup %2144 }
 0x4e3   :  { %2033 = vmatprep.subr.bf16.mxu1 %v2032_v24  ;;  %v482_v27 = vmul.f32 %v2145_v16, %v2135_v60 }
 0x4e4   :  { %2035 = vmatpush3.bf16.msra.mxu1 %v2032_v24  ;;  %1921 = vmatprep.mubr.msk.f32.mxu1 %vm440_vm5, %v481_v19  ;;  %v653_v19 = vsub.s32 3, %v2270_v13 }
 0x4e5   :  { %2037 = vmatprep.subr.bf16.mxu1 %v2036_v25  ;;  %v2147_v26 = vpop.eup %2146 }
 0x4e6   :  { %v2149_v28 = vpop.eup %2148  ;;  %v483_v29 = vmul.f32 %v2147_v26, %v2139_v1  ;;  %v2040_v1 = vpack.c.bf16 %v20_v0, %v19_v63  ;;  %v654_v16 = vrot.slane %v2306_v47, %v653_v19 }
 0x4e7   :  { %v484_v30 = vmul.f32 %v2149_v28, %v2141_v3  ;;  %v21_v3 = vld [vmem:[%s2611_s2 + $0x30] sm:$0xff] }
 0x4e8   :  { %2039 = vmatpush3.bf16.msra.mxu1 %v2036_v25  ;;  %v2044_v5 = vpack.c.bf16 %v22_v4, %v21_v3  ;;  %v661_v25 = vsub.s32 4, %v2270_v13 }
 0x4e9   :  { %2041 = vmatprep.subr.bf16.mxu1 %v2040_v1 }
 0x4ea   :  { %2045 = vmatprep.subr.bf16.mxu0 %v2044_v5 }
 0x4eb   :  { %1922 = vmatmul.mubr.msk.f32.vlgmr.msra.gmra.mrb[4].mxu1 %vm440_vm5, %v482_v27  ;;  %2047 = vmatpush3.bf16.msra.mxu0 %v2044_v5 }
 0x4ec   :  { %1924 = vmatprep.mubr.msk.f32.mxu1 %vm440_vm5, %v483_v29  ;;  %2043 = vmatpush3.bf16.msra.mxu1 %v2040_v1 }
 0x4ef   :  { %1925 = vmatmul.mubr.msk.f32.gmra.mrb[6].mxu1 %vm440_vm5, %v484_v30  ;;  %v662_v30 = vrot.slane %v2306_v47, %v661_v25 }
 0x5be   :  { %v1923_v31 = vpop.f32.mrb[4].mxu1 }
 0x5bf   :  { %v595_v32 = vadd.f32 %v1923_v31, %v2321_v2  ;;  %v575_v33 = vpop.f32.mrb[5].mxu1 }
 0x5c0   :  { %v594_v34 = vadd.f32 %v575_v33, %v2317_v62 }
 0x5c1   :  { %v601_v35 = vsel %vm229_vm3, %v595_v32, 0.0 }
 0x5c2   :  { %602 = vadd.xlane.f32.xlu0 %v601_v35  ;;  %v1926_v36 = vpop.f32.mrb[6].mxu1  ;;  %v598_v37 = vsel %vm229_vm3, %v594_v34, 0.0 }
 0x5c3   :  { %v597_v38 = vadd.f32 %v1926_v36, %v2329_v11  ;;  %599 = vadd.xlane.f32.xlu1 %v598_v37  ;;  %v585_v39 = vpop.f32.mrb[7].mxu1 }
 0x5c4   :  { %v596_v40 = vadd.f32 %v585_v39, %v2325_v7 }
 0x5c5   :  { %v607_v41 = vsel %vm229_vm3, %v597_v38, 0.0 }
 0x5c6   :  { %v604_v42 = vsel %vm229_vm3, %v596_v40, 0.0 }
 0x5c7   :  { %608 = vadd.xlane.f32.xlu1 %v607_v41  ;;  %605 = vadd.xlane.f32.xlu0 %v604_v42 }
 0x64f   :  { %v603_v2 = vpop.xlane.xlu0 %602 }
 0x650   :  { %v612_v62 = vmul.f32 0.0625, %v603_v2  ;;  %v600_v43 = vpop.xlane.xlu1 %599  ;;  %v669_v2 = vsub.s32 5, %v2270_v13 }
 0x651   :  { %v611_v44 = vmul.f32 0.0625, %v600_v43 }
 0x652   :  { %v616_v45 = vsub.f32 %v595_v32, %v612_v62  ;;  %v670_v62 = vrot.slane %v2306_v47, %v669_v2 }
 0x653   :  { %v615_v48 = vsub.f32 %v594_v34, %v611_v44 }
 0x654   :  { %v609_v49 = vpop.xlane.xlu1 %608  ;;  %v606_v50 = vpop.xlane.xlu0 %605  ;;  %v620_v52 = vmul.f32 %v616_v45, %v616_v45 }
 0x655   :  { %v614_v11 = vmul.f32 0.0625, %v609_v49  ;;  %v613_v53 = vmul.f32 0.0625, %v606_v50  ;;  %v619_v54 = vmul.f32 %v615_v48, %v615_v48 }
 0x656   :  { %v626_v7 = vsel %vm229_vm3, %v620_v52, 0.0 }
 0x657   :  { %v618_v55 = vsub.f32 %v597_v38, %v614_v11  ;;  %v617_v56 = vsub.f32 %v596_v40, %v613_v53  ;;  %627 = vadd.xlane.f32.xlu1 %v626_v7  ;;  %v623_v57 = vsel %vm229_vm3, %v619_v54, 0.0 }
 0x658   :  { %624 = vadd.xlane.f32.xlu0 %v623_v57 }
 0x659   :  { %v622_v58 = vmul.f32 %v618_v55, %v618_v55  ;;  %v621_v59 = vmul.f32 %v617_v56, %v617_v56 }
 0x65b   :  { %v632_v60 = vsel %vm229_vm3, %v622_v58, 0.0  ;;  %v629_v61 = vsel %vm229_vm3, %v621_v59, 0.0 }
 0x65c   :  { %633 = vadd.xlane.f32.xlu1 %v632_v60  ;;  %630 = vadd.xlane.f32.xlu0 %v629_v61 }
 0x6e4   :  { %v628_v6 = vpop.xlane.xlu1 %627 }
 0x6e5   :  { %v636_v8 = vmul.f32 0.0625, %v628_v6  ;;  %v625_v9 = vpop.xlane.xlu0 %624 }
 0x6e6   :  { %v635_v10 = vmul.f32 0.0625, %v625_v9 }
 0x6e7   :  { %v640_v12 = vadd.f32 1e-05, %v636_v8 }
 0x6e8   :  { %v639_v14 = vadd.f32 1e-05, %v635_v10 }
 0x6e9   :  { %2150 = vrsqrt.f32 %v640_v12  ;;  %v634_v17 = vpop.xlane.xlu1 %633  ;;  %v631_v18 = vpop.xlane.xlu0 %630 }
 0x6ea   :  { %2152 = vrsqrt.f32 %v639_v14  ;;  %v638_v20 = vmul.f32 0.0625, %v634_v17  ;;  %v637_v21 = vmul.f32 0.0625, %v631_v18 }
 0x6ec   :  { %v642_v22 = vadd.f32 1e-05, %v638_v20  ;;  %v641_v24 = vadd.f32 1e-05, %v637_v21 }
 0x6ee   :  { %2154 = vrsqrt.f32 %v642_v22 }
 0x6ef   :  { %2156 = vrsqrt.f32 %v641_v24 }
 0x6f3   :  { %v2151_v26 = vpop.eup %2150 }
 0x6f4   :  { %v2153_v27 = vpop.eup %2152  ;;  %v648_v28 = vmul.f32 %v2151_v26, %v616_v45 }
 0x6f5   :  { %v647_v29 = vmul.f32 %v2153_v27, %v615_v48 }
 0x6f6   :  { %v656_v31 = vmul.f32 %v654_v16, %v648_v28 }
 0x6f7   :  { %v655_v32 = vmul.f32 %v654_v16, %v647_v29 }
 0x6f8   :  { %v2155_v33 = vpop.eup %2154  ;;  %v664_v37 = vadd.f32 %v662_v30, %v656_v31 }
 0x6f9   :  { %v2157_v34 = vpop.eup %2156  ;;  %v663_v35 = vadd.f32 %v662_v30, %v655_v32  ;;  %v650_v36 = vmul.f32 %v2155_v33, %v618_v55 }
 0x6fa   :  { %v649_v38 = vmul.f32 %v2157_v34, %v617_v56  ;;  %v774_v56 = vsub.s32 6, %v2270_v13 }
 0x6fb   :  { %1931 = vmatprep.mubr.msk.f32.mxu1 %vm229_vm3, %v663_v35  ;;  %v658_v39 = vmul.f32 %v654_v16, %v650_v36 }
 0x6fc   :  { %1932 = vmatmul.mubr.msk.f32.vlgmr.msra.gmra.mrb[8].mxu1 %vm229_vm3, %v664_v37  ;;  %v657_v40 = vmul.f32 %v654_v16, %v649_v38  ;;  %v775_v57 = vrot.slane %v2306_v47, %v774_v56 }
 0x6fd   :  { %v666_v41 = vadd.f32 %v662_v30, %v658_v39  ;;  %v23_v39 = vld [vmem:[%s2611_s2 + $0x40] sm:$0xff] }
 0x6fe   :  { %v665_v42 = vadd.f32 %v662_v30, %v657_v40  ;;  %v24_v40 = vld [vmem:[%s2611_s2 + $0x48] sm:$0xff] }
 0x700   :  { %1934 = vmatprep.mubr.msk.f32.mxu1 %vm229_vm3, %v665_v42 }
 0x701   :  { %1935 = vmatmul.mubr.msk.f32.gmra.mrb[10].mxu1 %vm229_vm3, %v666_v41 }
 0x7cf   :  { %v1933_v43 = vpop.f32.mrb[8].mxu1 }
 0x7d0   :  { %v755_v44 = vadd.f32 %v1933_v43, %v670_v62  ;;  %v749_v45 = vpop.f32.mrb[9].mxu1 }
 0x7d1   :  { %v750_v48 = vadd.f32 %v749_v45, %v670_v62 }
 0x7d2   :  { %v769_v50 = vmax.f32 %v755_v44, 0.0 }
 0x7d3   :  { %v768_v49 = vmax.f32 %v750_v48, 0.0 }
 0x7d4   :  { %v1936_v52 = vpop.f32.mrb[10].mxu1 }
 0x7d5   :  { %v765_v11 = vadd.f32 %v1936_v52, %v670_v62  ;;  %v759_v53 = vpop.f32.mrb[11].mxu1  ;;  %1941 = vmatprep.mubr.msk.f32.mxu0 %vm229_vm3, %v768_v49 }
 0x7d6   :  { %v760_v54 = vadd.f32 %v759_v53, %v670_v62  ;;  %1942 = vmatmul.mubr.msk.f32.vlgmr.msra.gmra.mrb[8].mxu0 %vm229_vm3, %v769_v50 }
 0x7d7   :  { %v771_v55 = vmax.f32 %v765_v11, 0.0 }
 0x7d8   :  { %v770_v7 = vmax.f32 %v760_v54, 0.0 }
 0x7da   :  { %1944 = vmatprep.mubr.msk.f32.mxu0 %vm229_vm3, %v770_v7  ;;  %v931_v7 = vsub.s32 7, %v2270_v13 }
 0x7db   :  { %1945 = vmatmul.mubr.msk.f32.gmra.mrb[10].mxu0 %vm229_vm3, %v771_v55  ;;  %v2453_v55 = vld [vmem:[%s2611_s2 + $0x8] sm:$0xff] }
 0x8a9   :  { %v1943_v58 = vpop.f32.mrb[8].mxu0 }
 0x8aa   :  { %v860_v59 = vadd.f32 %v1943_v58, %v775_v57  ;;  %v854_v60 = vpop.f32.mrb[9].mxu0 }
 0x8ab   :  { %v855_v61 = vadd.f32 %v854_v60, %v775_v57  ;;  %v940_v60 = vrot.slane %v2453_v55, %v2273_v15 }
 0x8ac   :  { %v874_v63 = vadd.f32 %v860_v59, %v664_v37 }
 0x8ad   :  { %v873_v0 = vadd.f32 %v855_v61, %v663_v35 }
 0x8ae   :  { %v1946_v1 = vpop.f32.mrb[10].mxu0  ;;  %v880_v3 = vsel %vm229_vm3, %v874_v63, 0.0 }
 0x8af   :  { %v870_v4 = vadd.f32 %v1946_v1, %v775_v57  ;;  %v864_v5 = vpop.f32.mrb[11].mxu0  ;;  %881 = vadd.xlane.f32.xlu1 %v880_v3  ;;  %v877_v6 = vsel %vm229_vm3, %v873_v0, 0.0 }
 0x8b0   :  { %v865_v8 = vadd.f32 %v864_v5, %v775_v57  ;;  %878 = vadd.xlane.f32.xlu0 %v877_v6  ;;  %v932_v57 = vrot.slane %v2306_v47, %v931_v7  ;;  %v29_v5 = vld [vmem:[%s2611_s2 + $0x70] sm:$0xff]  ;;  %v30_v47 = vld [vmem:[%s2611_s2 + $0x78] sm:$0xff] }
 0x8b1   :  { %v876_v9 = vadd.f32 %v870_v4, %v666_v41  ;;  %v2048_v41 = vpack.c.bf16 %v24_v40, %v23_v39  ;;  %v47_v40 = vld [vmem:[%s2611_s2 + $0x100] sm:$0xff] }
 0x8b2   :  { %v875_v10 = vadd.f32 %v865_v8, %v665_v42 }
 0x8b3   :  { %v886_v12 = vsel %vm229_vm3, %v876_v9, 0.0  ;;  %2049 = vmatprep.subr.bf16.mxu1 %v2048_v41 }
 0x8b4   :  { %887 = vadd.xlane.f32.xlu1 %v886_v12  ;;  %v883_v14 = vsel %vm229_vm3, %v875_v10, 0.0  ;;  %2051 = vmatpush3.bf16.msra.mxu1 %v2048_v41  ;;  %v46_v41 = vld [vmem:[%s2611_s2 + $0xf8] sm:$0xff] }
 0x8b5   :  { %884 = vadd.xlane.f32.xlu0 %v883_v14 }
 0x93c   :  { %v882_v17 = vpop.xlane.xlu1 %881 }
 0x93d   :  { %v890_v18 = vmul.f32 0.0625, %v882_v17  ;;  %v879_v20 = vpop.xlane.xlu0 %878 }
 0x93e   :  { %v889_v21 = vmul.f32 0.0625, %v879_v20 }
 0x93f   :  { %v894_v22 = vsub.f32 %v874_v63, %v890_v18  ;;  %v31_v18 = vld [vmem:[%s2611_s2 + $0x80] sm:$0xff] }
 0x940   :  { %v893_v24 = vsub.f32 %v873_v0, %v889_v21 }
 0x941   :  { %v888_v16 = vpop.xlane.xlu1 %887  ;;  %v898_v26 = vmul.f32 %v894_v22, %v894_v22 }
 0x942   :  { %v892_v27 = vmul.f32 0.0625, %v888_v16  ;;  %v885_v28 = vpop.xlane.xlu0 %884  ;;  %v897_v29 = vmul.f32 %v893_v24, %v893_v24 }
 0x943   :  { %v891_v30 = vmul.f32 0.0625, %v885_v28  ;;  %v904_v31 = vsel %vm229_vm3, %v898_v26, 0.0 }
 0x944   :  { %v896_v32 = vsub.f32 %v876_v9, %v892_v27  ;;  %905 = vadd.xlane.f32.xlu1 %v904_v31  ;;  %v901_v33 = vsel %vm229_vm3, %v897_v29, 0.0 }
 0x945   :  { %v895_v34 = vsub.f32 %v875_v10, %v891_v30  ;;  %902 = vadd.xlane.f32.xlu0 %v901_v33 }
 0x946   :  { %v900_v35 = vmul.f32 %v896_v32, %v896_v32 }
 0x947   :  { %v899_v36 = vmul.f32 %v895_v34, %v895_v34 }
 0x948   :  { %v910_v37 = vsel %vm229_vm3, %v900_v35, 0.0 }
 0x949   :  { %911 = vadd.xlane.f32.xlu1 %v910_v37  ;;  %v907_v38 = vsel %vm229_vm3, %v899_v36, 0.0 }
 0x94a   :  { %908 = vadd.xlane.f32.xlu0 %v907_v38 }
 0x9d1   :  { %v906_v42 = vpop.xlane.xlu1 %905 }
 0x9d2   :  { %v914_v62 = vmul.f32 0.0625, %v906_v42  ;;  %v903_v43 = vpop.xlane.xlu0 %902 }
 0x9d3   :  { %v913_v44 = vmul.f32 0.0625, %v903_v43 }
 0x9d4   :  { %v918_v45 = vadd.f32 1e-05, %v914_v62 }
 0x9d5   :  { %v917_v48 = vadd.f32 1e-05, %v913_v44 }
 0x9d6   :  { %2158 = vrsqrt.f32 %v918_v45  ;;  %v912_v49 = vpop.xlane.xlu1 %911 }
 0x9d7   :  { %2160 = vrsqrt.f32 %v917_v48  ;;  %v916_v50 = vmul.f32 0.0625, %v912_v49  ;;  %v909_v52 = vpop.xlane.xlu0 %908  ;;  %v48_v48 = vld [vmem:[%s2611_s2 + $0x108] sm:$0xff] }
 0x9d8   :  { %v915_v11 = vmul.f32 0.0625, %v909_v52 }
 0x9d9   :  { %v920_v53 = vadd.f32 1e-05, %v916_v50 }
 0x9da   :  { %v919_v54 = vadd.f32 1e-05, %v915_v11 }
 0x9db   :  { %2162 = vrsqrt.f32 %v920_v53 }
 0x9dc   :  { %2164 = vrsqrt.f32 %v919_v54 }
 0x9e0   :  { %v2159_v58 = vpop.eup %2158 }
 0x9e1   :  { %v2161_v59 = vpop.eup %2160  ;;  %v926_v61 = vmul.f32 %v2159_v58, %v894_v22  ;;  %v32_v22 = vld [vmem:[%s2611_s2 + $0x88] sm:$0xff] }
 0x9e2   :  { %v925_v63 = vmul.f32 %v2161_v59, %v893_v24 }
 0x9e3   :  { %v934_v0 = vmul.f32 %v932_v57, %v926_v61 }
 0x9e4   :  { %v933_v1 = vmul.f32 %v932_v57, %v925_v63 }
 0x9e5   :  { %v2163_v3 = vpop.eup %2162  ;;  %v942_v4 = vadd.f32 %v940_v60, %v934_v0 }
 0x9e6   :  { %v2165_v6 = vpop.eup %2164  ;;  %v928_v8 = vmul.f32 %v2163_v3, %v896_v32  ;;  %v941_v9 = vadd.f32 %v940_v60, %v933_v1 }
 0x9e7   :  { %v927_v10 = vmul.f32 %v2165_v6, %v895_v34  ;;  %v2466_v14 = vadd.f32 %v942_v4, %v30_v47 }
 0x9e8   :  { %v2464_v12 = vadd.f32 %v941_v9, %v29_v5  ;;  %v936_v15 = vmul.f32 %v932_v57, %v928_v8 }
 0x9e9   :  { %v935_v17 = vmul.f32 %v932_v57, %v927_v10 }
 0x9ea   :  { %1951 = vmatprep.mubr.msk.f32.mxu1 %vm229_vm3, %v2464_v12  ;;  %v944_v20 = vadd.f32 %v940_v60, %v936_v15 }
 0x9eb   :  { %1952 = vmatmul.mubr.msk.f32.vlgmr.msra.gmra.mrb[12].mxu1 %vm229_vm3, %v2466_v14  ;;  %v943_v21 = vadd.f32 %v940_v60, %v935_v17 }
 0x9ec   :  { %v2480_v16 = vadd.f32 %v944_v20, %v32_v22 }
 0x9ed   :  { %v2478_v24 = vadd.f32 %v943_v21, %v31_v18 }
 0x9ef   :  { %1954 = vmatprep.mubr.msk.f32.mxu1 %vm229_vm3, %v2478_v24 }
 0x9f0   :  { %1955 = vmatmul.mubr.msk.f32.gmra.mrb[14].mxu1 %vm229_vm3, %v2480_v16 }
 0xabe   :  { %v1953_v26 = vpop.f32.mrb[12].mxu1 }
 0xabf   :  { %v1027_v27 = vpop.f32.mrb[13].mxu1 }
 0xac0   :  { %v2486_v28 = vpack.i.bf16 %v1953_v26, %v1027_v27  ;;  %1965 = vmatprep.mubr.msk.f32.mxu0 %vm229_vm3, %v1027_v27 }
 0xac2   :  { %2113 = vrot.lane.b32.xlu0 %v2486_v28, %s2222_s9 }
 0xac3   :  { %v1956_v29 = vpop.f32.mrb[14].mxu1 }
 0xac4   :  { %v1037_v30 = vpop.f32.mrb[15].mxu1 }
 0xac5   :  { %v2491_v31 = vpack.i.bf16 %v1956_v29, %v1037_v30 }
 0xac7   :  { %2118 = vrot.lane.b32.xlu1 %v2491_v31, %s2222_s9 }
 0xb34   :  { %v2114_v32 = vpop.permute.xlu0 %2113 }
 0xb35   :  { %v2116_v33 = vunpack.i.h.bf16 %v2114_v32  ;;  %v2115_v34 = vunpack.i.l.bf16 %v2114_v32 }
 0xb37   :  { %v2052_v35 = vpack.c.bf16 %v2116_v33, %v2115_v34 }
 0xb39   :  { %v2119_v36 = vpop.permute.xlu1 %2118  ;;  %2054 = vmatprep.subr.msk.bf16.mxu0 %vm2344_vm4, %v2052_v35 }
 0xb3a   :  { %v2121_v37 = vunpack.i.h.bf16 %v2119_v36  ;;  %v2120_v38 = vunpack.i.l.bf16 %v2119_v36  ;;  %2057 = vmatpush3.bf16.xpose.msk.msra.mxu0 %vm2344_vm4, %v2052_v35 }
 0xb3c   :  { %v2058_v39 = vpack.c.bf16 %v2121_v37, %v2120_v38 }
 0xb3e   :  { %2060 = vmatprep.subr.msk.bf16.mxu0 %vm2344_vm4, %v2058_v39 }
 0xb42   :  { %2063 = vmatpush3.bf16.xpose.msk.msra.mxu0 %vm2344_vm4, %v2058_v39 }
 0xb49   :  { %1966 = vmatmul.mubr.msk.f32.vlgmr.msra.gmra.mrb[12].mxu0 %vm229_vm3, %v1953_v26 }
 0xb4a   :  { %1968 = vmatprep.mubr.msk.f32.mxu0 %vm229_vm3, %v1037_v30 }
 0xb4d   :  { %1969 = vmatmul.mubr.msk.f32.gmra.mrb[14].mxu0 %vm229_vm3, %v1956_v29 }
 0xc1c   :  { %v1967_v42 = vpop.f32.mrb[12].mxu0 }
 0xc1d   :  { %v1146_v62 = vadd.f32 %v1967_v42, %v47_v40  ;;  %v1140_v43 = vpop.f32.mrb[13].mxu0 }
 0xc1e   :  { %v1141_v44 = vadd.f32 %v1140_v43, %v46_v41 }
 0xc1f   :  { %v1162_v45 = vsel %vm440_vm5, %v1146_v62, -inf }
 0xc20   :  { %1163 = vmax.xlane.f32.xlu0 %v1162_v45  ;;  %v1970_v49 = vpop.f32.mrb[14].mxu0  ;;  %v1159_v50 = vsel %vm440_vm5, %v1141_v44, -inf }
 0xc21   :  { %v1156_v52 = vadd.f32 %v1970_v49, %v49_v23  ;;  %v1150_v11 = vpop.f32.mrb[15].mxu0  ;;  %1160 = vmax.xlane.f32.xlu1 %v1159_v50 }
 0xc22   :  { %v1151_v53 = vadd.f32 %v1150_v11, %v48_v48 }
 0xc23   :  { %v1168_v54 = vsel %vm440_vm5, %v1156_v52, -inf }
 0xc24   :  { %v1165_v7 = vsel %vm440_vm5, %v1151_v53, -inf }
 0xc25   :  { %1166 = vmax.xlane.f32.xlu0 %v1165_v7  ;;  %1169 = vmax.xlane.f32.xlu1 %v1168_v54 }
 0xcad   :  { %v1164_v57 = vpop.xlane.xlu0 %1163 }
 0xcae   :  { %v1172_v58 = vsub.f32 %v1146_v62, %v1164_v57  ;;  %v1161_v59 = vpop.xlane.xlu1 %1160 }
 0xcaf   :  { %v1171_v60 = vsub.f32 %v1141_v44, %v1161_v59 }
 0xcb0   :  { %v1177_v61 = vmul.f32 1.442695, %v1172_v58 }
 0xcb1   :  { %v1175_v63 = vmul.f32 1.442695, %v1171_v60 }
 0xcb2   :  { %2166 = vpow2.f32 %v1177_v61  ;;  %v1167_v0 = vpop.xlane.xlu0 %1166  ;;  %v1170_v1 = vpop.xlane.xlu1 %1169 }
 0xcb3   :  { %2168 = vpow2.f32 %v1175_v63  ;;  %v1173_v3 = vsub.f32 %v1151_v53, %v1167_v0  ;;  %v1174_v4 = vsub.f32 %v1156_v52, %v1170_v1 }
 0xcb5   :  { %v1179_v5 = vmul.f32 1.442695, %v1173_v3  ;;  %v1181_v6 = vmul.f32 1.442695, %v1174_v4 }
 0xcb7   :  { %2170 = vpow2.f32 %v1179_v5 }
 0xcb8   :  { %2172 = vpow2.f32 %v1181_v6 }
 0xcbc   :  { %v2167_v8 = vpop.eup %2166 }
 0xcbd   :  { %v2169_v9 = vpop.eup %2168  ;;  %v1186_v47 = vsel %vm440_vm5, %v2167_v8, 0.0 }
 0xcbe   :  { %1187 = vadd.xlane.f32.xlu1 %v1186_v47  ;;  %v1183_v10 = vsel %vm440_vm5, %v2169_v9, 0.0 }
 0xcbf   :  { %1184 = vadd.xlane.f32.xlu0 %v1183_v10 }
 0xcc1   :  { %v2171_v15 = vpop.eup %2170 }
 0xcc2   :  { %v2173_v17 = vpop.eup %2172  ;;  %v1189_v18 = vsel %vm440_vm5, %v2171_v15, 0.0 }
 0xcc3   :  { %1190 = vadd.xlane.f32.xlu0 %v1189_v18  ;;  %v1192_v20 = vsel %vm440_vm5, %v2173_v17, 0.0 }
 0xcc4   :  { %1193 = vadd.xlane.f32.xlu1 %v1192_v20  ;;  %v27_v20 = vld [vmem:[%s2611_s2 + $0x60] sm:$0xff] }
 0xcd5   :  { %2128 = vrot.lane.b32.xlu1 %v2491_v31, %s2223_s18 }
 0xcd9   :  { %2123 = vrot.lane.b32.xlu0 %v2486_v28, %s2223_s18 }
 0xd4b   :  { %v1188_v21 = vpop.xlane.xlu1 %1187 }
 0xd4c   :  { %v1185_v22 = vpop.xlane.xlu0 %1184 }
 0xd4d   :  { %2174 = vrcp.f32 %v1185_v22 }
 0xd4e   :  { %2176 = vrcp.f32 %v1188_v21  ;;  %v28_v21 = vld [vmem:[%s2611_s2 + $0x68] sm:$0xff] }
 0xd4f   :  { %v2076_v22 = vpack.c.bf16 %v28_v21, %v27_v20 }
 0xd50   :  { %v1191_v26 = vpop.xlane.xlu0 %1190 }
 0xd51   :  { %v1194_v27 = vpop.xlane.xlu1 %1193  ;;  %2178 = vrcp.f32 %v1191_v26  ;;  %2077 = vmatprep.subr.bf16.mxu0 %v2076_v22 }
 0xd52   :  { %2180 = vrcp.f32 %v1194_v27  ;;  %2079 = vmatpush3.bf16.msra.mxu0 %v2076_v22 }
 0xd54   :  { %v2124_v29 = vpop.permute.xlu0 %2123 }
 0xd55   :  { %v2126_v30 = vunpack.i.h.bf16 %v2124_v29  ;;  %v2125_v32 = vunpack.i.l.bf16 %v2124_v29  ;;  %v2129_v33 = vpop.permute.xlu1 %2128 }
 0xd56   :  { %v2131_v34 = vunpack.i.h.bf16 %v2129_v33  ;;  %v2130_v35 = vunpack.i.l.bf16 %v2129_v33 }
 0xd57   :  { %v2175_v36 = vpop.eup %2174  ;;  %v2064_v37 = vpack.c.bf16 %v2126_v30, %v2125_v32 }
 0xd58   :  { %v1199_v31 = vmul.f32 %v2175_v36, %v2169_v9  ;;  %v2068_v38 = vpack.c.bf16 %v2131_v34, %v2130_v35  ;;  %v2177_v28 = vpop.eup %2176 }
 0xd59   :  { %2065 = vmatprep.subr.bf16.mxu1 %v2064_v37  ;;  %v1200_v40 = vmul.f32 %v2177_v28, %v2167_v8  ;;  %v1371_v28 = vrot.slane %v2453_v55, %v211_v46 }
 0xd5a   :  { %2067 = vmatpush3.bf16.msra.mxu1 %v2064_v37  ;;  %1979 = vmatprep.mubr.msk.f32.mxu1 %vm440_vm5, %v1199_v31 }
 0xd5b   :  { %2069 = vmatprep.subr.bf16.mxu1 %v2068_v38  ;;  %v2179_v39 = vpop.eup %2178 }
 0xd5c   :  { %v2181_v41 = vpop.eup %2180  ;;  %v1201_v42 = vmul.f32 %v2179_v39, %v2171_v15  ;;  %v25_v15 = vld [vmem:[%s2611_s2 + $0x50] sm:$0xff] }
 0xd5d   :  { %v1202_v62 = vmul.f32 %v2181_v41, %v2173_v17  ;;  %v26_v17 = vld [vmem:[%s2611_s2 + $0x58] sm:$0xff] }
 0xd5e   :  { %2071 = vmatpush3.bf16.msra.mxu1 %v2068_v38  ;;  %v2072_v18 = vpack.c.bf16 %v26_v17, %v25_v15 }
 0xd60   :  { %2073 = vmatprep.subr.bf16.mxu1 %v2072_v18 }
 0xd61   :  { %1980 = vmatmul.mubr.msk.f32.vlgmr.msra.gmra.mrb[16].mxu1 %vm440_vm5, %v1200_v40 }
 0xd62   :  { %1982 = vmatprep.mubr.msk.f32.mxu1 %vm440_vm5, %v1201_v42  ;;  %2075 = vmatpush3.bf16.msra.mxu1 %v2072_v18 }
 0xd65   :  { %1983 = vmatmul.mubr.msk.f32.gmra.mrb[18].mxu1 %vm440_vm5, %v1202_v62  ;;  %v1379_v62 = vrot.slane %v2453_v55, %v223_v51  ;;  %v1387_v51 = vrot.slane %v2453_v55, %v653_v19  ;;  %v1492_v19 = vrot.slane %v2453_v55, %v661_v25 }
 0xe34   :  { %v1981_v43 = vpop.f32.mrb[16].mxu1 }
 0xe35   :  { %v1313_v44 = vadd.f32 %v1981_v43, %v2466_v14  ;;  %v1293_v23 = vpop.f32.mrb[17].mxu1 }
 0xe36   :  { %v1312_v45 = vadd.f32 %v1293_v23, %v2464_v12 }
 0xe37   :  { %v1319_v48 = vsel %vm229_vm3, %v1313_v44, 0.0 }
 0xe38   :  { %1320 = vadd.xlane.f32.xlu0 %v1319_v48  ;;  %v1984_v49 = vpop.f32.mrb[18].mxu1  ;;  %v1316_v50 = vsel %vm229_vm3, %v1312_v45, 0.0 }
 0xe39   :  { %v1315_v52 = vadd.f32 %v1984_v49, %v2480_v16  ;;  %1317 = vadd.xlane.f32.xlu1 %v1316_v50  ;;  %v1303_v11 = vpop.f32.mrb[19].mxu1 }
 0xe3a   :  { %v1314_v53 = vadd.f32 %v1303_v11, %v2478_v24 }
 0xe3b   :  { %v1325_v54 = vsel %vm229_vm3, %v1315_v52, 0.0 }
 0xe3c   :  { %v1322_v7 = vsel %vm229_vm3, %v1314_v53, 0.0 }
 0xe3d   :  { %1326 = vadd.xlane.f32.xlu1 %v1325_v54  ;;  %1323 = vadd.xlane.f32.xlu0 %v1322_v7 }
 0xec5   :  { %v1321_v14 = vpop.xlane.xlu0 %1320 }
 0xec6   :  { %v1329_v12 = vmul.f32 0.0625, %v1321_v14  ;;  %v1318_v57 = vpop.xlane.xlu1 %1317 }
 0xec7   :  { %v1328_v58 = vmul.f32 0.0625, %v1318_v57 }
 0xec8   :  { %v1333_v59 = vsub.f32 %v1313_v44, %v1329_v12 }
 0xec9   :  { %v1332_v60 = vsub.f32 %v1312_v45, %v1328_v58 }
 0xeca   :  { %v1327_v61 = vpop.xlane.xlu1 %1326  ;;  %v1324_v63 = vpop.xlane.xlu0 %1323  ;;  %v1337_v0 = vmul.f32 %v1333_v59, %v1333_v59 }
 0xecb   :  { %v1331_v16 = vmul.f32 0.0625, %v1327_v61  ;;  %v1330_v1 = vmul.f32 0.0625, %v1324_v63  ;;  %v1336_v3 = vmul.f32 %v1332_v60, %v1332_v60 }
 0xecc   :  { %v1343_v24 = vsel %vm229_vm3, %v1337_v0, 0.0 }
 0xecd   :  { %v1335_v4 = vsub.f32 %v1315_v52, %v1331_v16  ;;  %v1334_v5 = vsub.f32 %v1314_v53, %v1330_v1  ;;  %1344 = vadd.xlane.f32.xlu1 %v1343_v24  ;;  %v1340_v6 = vsel %vm229_vm3, %v1336_v3, 0.0 }
 0xece   :  { %1341 = vadd.xlane.f32.xlu0 %v1340_v6 }
 0xecf   :  { %v1339_v8 = vmul.f32 %v1335_v4, %v1335_v4  ;;  %v1338_v9 = vmul.f32 %v1334_v5, %v1334_v5 }
 0xed1   :  { %v1349_v47 = vsel %vm229_vm3, %v1339_v8, 0.0  ;;  %v1346_v10 = vsel %vm229_vm3, %v1338_v9, 0.0 }
 0xed2   :  { %1350 = vadd.xlane.f32.xlu1 %v1349_v47  ;;  %1347 = vadd.xlane.f32.xlu0 %v1346_v10 }
 0xf5a   :  { %v1345_v26 = vpop.xlane.xlu1 %1344 }
 0xf5b   :  { %v1353_v27 = vmul.f32 0.0625, %v1345_v26  ;;  %v1342_v29 = vpop.xlane.xlu0 %1341 }
 0xf5c   :  { %v1352_v30 = vmul.f32 0.0625, %v1342_v29 }
 0xf5d   :  { %v1357_v32 = vadd.f32 1e-05, %v1353_v27 }
 0xf5e   :  { %v1356_v33 = vadd.f32 1e-05, %v1352_v30 }
 0xf5f   :  { %2182 = vrsqrt.f32 %v1357_v32  ;;  %v1351_v34 = vpop.xlane.xlu1 %1350  ;;  %v1348_v35 = vpop.xlane.xlu0 %1347 }
 0xf60   :  { %2184 = vrsqrt.f32 %v1356_v33  ;;  %v1355_v36 = vmul.f32 0.0625, %v1351_v34  ;;  %v1354_v37 = vmul.f32 0.0625, %v1348_v35 }
 0xf62   :  { %v1359_v31 = vadd.f32 1e-05, %v1355_v36  ;;  %v1358_v38 = vadd.f32 1e-05, %v1354_v37 }
 0xf64   :  { %2186 = vrsqrt.f32 %v1359_v31 }
 0xf65   :  { %2188 = vrsqrt.f32 %v1358_v38 }
 0xf69   :  { %v2183_v39 = vpop.eup %2182 }
 0xf6a   :  { %v2185_v40 = vpop.eup %2184  ;;  %v1365_v41 = vmul.f32 %v2183_v39, %v1333_v59 }
 0xf6b   :  { %v1364_v42 = vmul.f32 %v2185_v40, %v1332_v60 }
 0xf6c   :  { %v1373_v43 = vmul.f32 %v1371_v28, %v1365_v41 }
 0xf6d   :  { %v1372_v44 = vmul.f32 %v1371_v28, %v1364_v42 }
 0xf6e   :  { %v2187_v23 = vpop.eup %2186  ;;  %v1381_v50 = vadd.f32 %v1379_v62, %v1373_v43 }
 0xf6f   :  { %v2189_v45 = vpop.eup %2188  ;;  %v1380_v48 = vadd.f32 %v1379_v62, %v1372_v44  ;;  %v1367_v49 = vmul.f32 %v2187_v23, %v1335_v4  ;;  %v2224_v23 = vmov 0.0|0.0  }
 0xf70   :  { %v1366_v52 = vmul.f32 %v2189_v45, %v1334_v5  ;;  %2080 = vmatprep.subr.bf16.mxu1 %v2224_v23  ;;  %v2226_v45 = vmov 0.0  }
 0xf71   :  { %1989 = vmatprep.mubr.msk.f32.mxu1 %vm229_vm3, %v1380_v48  ;;  %v1375_v11 = vmul.f32 %v1371_v28, %v1367_v49 }
 0xf72   :  { %1990 = vmatmul.mubr.msk.f32.vlgmr.msra.gmra.mrb[20].mxu1 %vm229_vm3, %v1381_v50  ;;  %v1374_v46 = vmul.f32 %v1371_v28, %v1366_v52 }
 0xf73   :  { %v1383_v53 = vadd.f32 %v1379_v62, %v1375_v11 }
 0xf74   :  { %v1382_v54 = vadd.f32 %v1379_v62, %v1374_v46 }
 0xf76   :  { %1992 = vmatprep.mubr.msk.f32.mxu1 %vm229_vm3, %v1382_v54 }
 0xf77   :  { %1993 = vmatmul.mubr.msk.f32.gmra.mrb[22].mxu1 %vm229_vm3, %v1383_v53 }
 0xf78   :  { %2013 = vmatprep.mubr.msk.f32.mxu1 %vm2225_vm6, %v2226_v45 }
0x1045   :  { %v1991_v7 = vpop.f32.mrb[20].mxu1 }
0x1046   :  { %v1472_v14 = vadd.f32 %v1991_v7, %v1387_v51  ;;  %v1466_v12 = vpop.f32.mrb[21].mxu1 }
0x1047   :  { %v1467_v57 = vadd.f32 %v1466_v12, %v1387_v51 }
0x1048   :  { %v1486_v59 = vmax.f32 %v1472_v14, 0.0 }
0x1049   :  { %v1485_v58 = vmax.f32 %v1467_v57, 0.0  ;;  %v1649_v57 = vrot.slane %v2453_v55, %v669_v2 }
0x104a   :  { %v1994_v60 = vpop.f32.mrb[22].mxu1 }
0x104b   :  { %v1482_v61 = vadd.f32 %v1994_v60, %v1387_v51  ;;  %v1476_v63 = vpop.f32.mrb[23].mxu1  ;;  %1999 = vmatprep.mubr.msk.f32.mxu0 %vm229_vm3, %v1485_v58  ;;  %v1657_v60 = vrot.slane %v2453_v55, %v774_v56  ;;  %v41_v56 = vld [vmem:[%s2611_s2 + $0xd0] sm:$0xff] }
0x104c   :  { %v1477_v0 = vadd.f32 %v1476_v63, %v1387_v51  ;;  %2000 = vmatmul.mubr.msk.f32.vlgmr.msra.gmra.mrb[16].mxu0 %vm229_vm3, %v1486_v59 }
0x104d   :  { %v1488_v1 = vmax.f32 %v1482_v61, 0.0 }
0x104e   :  { %v1487_v16 = vmax.f32 %v1477_v0, 0.0 }
0x1050   :  { %2002 = vmatprep.mubr.msk.f32.mxu0 %vm229_vm3, %v1487_v16 }
0x1051   :  { %2003 = vmatmul.mubr.msk.f32.gmra.mrb[18].mxu0 %vm229_vm3, %v1488_v1 }
0x111f   :  { %v2001_v3 = vpop.f32.mrb[16].mxu0 }
0x1120   :  { %v1577_v24 = vadd.f32 %v2001_v3, %v1492_v19  ;;  %v1571_v4 = vpop.f32.mrb[17].mxu0 }
0x1121   :  { %v1572_v5 = vadd.f32 %v1571_v4, %v1492_v19 }
0x1122   :  { %v1591_v6 = vadd.f32 %v1577_v24, %v1381_v50 }
0x1123   :  { %v1590_v8 = vadd.f32 %v1572_v5, %v1380_v48 }
0x1124   :  { %v2004_v9 = vpop.f32.mrb[18].mxu0  ;;  %v1597_v47 = vsel %vm229_vm3, %v1591_v6, 0.0 }
0x1125   :  { %v1587_v10 = vadd.f32 %v2004_v9, %v1492_v19  ;;  %v1581_v15 = vpop.f32.mrb[19].mxu0  ;;  %1598 = vadd.xlane.f32.xlu1 %v1597_v47  ;;  %v1594_v17 = vsel %vm229_vm3, %v1590_v8, 0.0 }
0x1126   :  { %v1582_v18 = vadd.f32 %v1581_v15, %v1492_v19  ;;  %1595 = vadd.xlane.f32.xlu0 %v1594_v17 }
0x1127   :  { %v1593_v20 = vadd.f32 %v1587_v10, %v1383_v53 }
0x1128   :  { %v1592_v21 = vadd.f32 %v1582_v18, %v1382_v54 }
0x1129   :  { %v1603_v25 = vsel %vm229_vm3, %v1593_v20, 0.0 }
0x112a   :  { %1604 = vadd.xlane.f32.xlu1 %v1603_v25  ;;  %v1600_v22 = vsel %vm229_vm3, %v1592_v21, 0.0 }
0x112b   :  { %1601 = vadd.xlane.f32.xlu0 %v1600_v22 }
0x11b2   :  { %v1599_v26 = vpop.xlane.xlu1 %1598 }
0x11b3   :  { %v1607_v27 = vmul.f32 0.0625, %v1599_v26  ;;  %v1596_v29 = vpop.xlane.xlu0 %1595 }
0x11b4   :  { %v1606_v30 = vmul.f32 0.0625, %v1596_v29 }
0x11b5   :  { %v1611_v32 = vsub.f32 %v1591_v6, %v1607_v27 }
0x11b6   :  { %v1610_v33 = vsub.f32 %v1590_v8, %v1606_v30 }
0x11b7   :  { %v1605_v34 = vpop.xlane.xlu1 %1604  ;;  %v1615_v35 = vmul.f32 %v1611_v32, %v1611_v32 }
0x11b8   :  { %v1609_v36 = vmul.f32 0.0625, %v1605_v34  ;;  %v1602_v37 = vpop.xlane.xlu0 %1601  ;;  %v1614_v31 = vmul.f32 %v1610_v33, %v1610_v33 }
0x11b9   :  { %v1608_v38 = vmul.f32 0.0625, %v1602_v37  ;;  %v1621_v28 = vsel %vm229_vm3, %v1615_v35, 0.0 }
0x11ba   :  { %v1613_v39 = vsub.f32 %v1593_v20, %v1609_v36  ;;  %1622 = vadd.xlane.f32.xlu1 %v1621_v28  ;;  %v1618_v40 = vsel %vm229_vm3, %v1614_v31, 0.0 }
0x11bb   :  { %v1612_v41 = vsub.f32 %v1592_v21, %v1608_v38  ;;  %1619 = vadd.xlane.f32.xlu0 %v1618_v40 }
0x11bc   :  { %v1617_v42 = vmul.f32 %v1613_v39, %v1613_v39 }
0x11bd   :  { %v1616_v62 = vmul.f32 %v1612_v41, %v1612_v41 }
0x11be   :  { %v1627_v43 = vsel %vm229_vm3, %v1617_v42, 0.0 }
0x11bf   :  { %1628 = vadd.xlane.f32.xlu1 %v1627_v43  ;;  %v1624_v44 = vsel %vm229_vm3, %v1616_v62, 0.0 }
0x11c0   :  { %1625 = vadd.xlane.f32.xlu0 %v1624_v44 }
0x1247   :  { %v1623_v48 = vpop.xlane.xlu1 %1622 }
0x1248   :  { %v1631_v49 = vmul.f32 0.0625, %v1623_v48  ;;  %v1620_v50 = vpop.xlane.xlu0 %1619 }
0x1249   :  { %v1630_v52 = vmul.f32 0.0625, %v1620_v50 }
0x124a   :  { %v1635_v11 = vadd.f32 1e-05, %v1631_v49 }
0x124b   :  { %v1634_v46 = vadd.f32 1e-05, %v1630_v52 }
0x124c   :  { %2190 = vrsqrt.f32 %v1635_v11  ;;  %v1629_v53 = vpop.xlane.xlu1 %1628 }
0x124d   :  { %2192 = vrsqrt.f32 %v1634_v46  ;;  %v1633_v54 = vmul.f32 0.0625, %v1629_v53  ;;  %v1626_v51 = vpop.xlane.xlu0 %1625 }
0x124e   :  { %v1632_v7 = vmul.f32 0.0625, %v1626_v51 }
0x124f   :  { %v1637_v14 = vadd.f32 1e-05, %v1633_v54 }
0x1250   :  { %v1636_v12 = vadd.f32 1e-05, %v1632_v7 }
0x1251   :  { %2194 = vrsqrt.f32 %v1637_v14 }
0x1252   :  { %2196 = vrsqrt.f32 %v1636_v12 }
0x1256   :  { %v2191_v58 = vpop.eup %2190 }
0x1257   :  { %v2193_v59 = vpop.eup %2192  ;;  %v1643_v61 = vmul.f32 %v2191_v58, %v1611_v32 }
0x1258   :  { %v1642_v63 = vmul.f32 %v2193_v59, %v1610_v33 }
0x1259   :  { %v1651_v0 = vmul.f32 %v1649_v57, %v1643_v61 }
0x125a   :  { %v1650_v16 = vmul.f32 %v1649_v57, %v1642_v63 }
0x125b   :  { %v2195_v1 = vpop.eup %2194  ;;  %v1659_v19 = vadd.f32 %v1657_v60, %v1651_v0 }
0x125c   :  { %v2197_v3 = vpop.eup %2196  ;;  %v1645_v24 = vmul.f32 %v2195_v1, %v1613_v39  ;;  %v1658_v4 = vadd.f32 %v1657_v60, %v1650_v16 }
0x125d   :  { %v1644_v5 = vmul.f32 %v2197_v3, %v1612_v41 }
0x125e   :  { %v2081_v6 = vpack.c.bf16 %v1659_v19, %v1658_v4  ;;  %v1653_v8 = vmul.f32 %v1649_v57, %v1645_v24 }
0x125f   :  { %v1652_v9 = vmul.f32 %v1649_v57, %v1644_v5 }
0x1260   :  { %2082 = vmatpush3.bf16.msra.mxu1 %v2081_v6  ;;  %v1661_v2 = vadd.f32 %v1657_v60, %v1653_v8 }
0x1261   :  { %2083 = vmatprep.subr.bf16.mxu1 %v2224_v23  ;;  %v1660_v47 = vadd.f32 %v1657_v60, %v1652_v9 }
0x1263   :  { %v2084_v13 = vpack.c.bf16 %v1661_v2, %v1660_v47 }
0x1265   :  { %2085 = vmatpush3.bf16.msra.mxu1 %v2084_v13 }
0x1268   :  { %2014 = vmatmul.mubr.msk.f32.vlgmr.msra.gmra.mrb[24].mxu1 %vm440_vm5, %v41_v56 }
0x133b   :  { %v1731_v55 = vpop.f32.mrb[24].mxu1 }
0x133c   :  { %1735 = vst.msk [vmem:[#allocation2] sm:$0xff] %vm229_vm3, %v1731_v55  ;;  %v2015_v10 = vpop.f32.mrb[25].mxu1 }
0x133d   :  { %2209 = shalt.err (!%p2206_p4)
}
0x133e   :  { %s2210_s2 = scalar_lea.hbm %s2612_s3, 128 }
0x133f   :  { %p2211_p5 = scmp.ne.s32.totalorder %s2612_s3, %s2210_s2  ;;  %p2214_p6 = scmp.lt.u32.totalorder %s2210_s2, %s2612_s3 }
0x1341   :  { %p2216_p7 = pnand %p2214_p6, %p2211_p5 }
0x1343   :  { %2219 = shalt.err (!%p2216_p7)
}
0x1344   :  { %1745 = dma.vmem_to_hbm [thread:$0]  %s1743_s29, 128, %s2612_s3, [#allocation3]  }
0x1345   :  { %2220 = dma.done.wait [#allocation3], 128  }
0x1346   :  { %2221 = vsyncadd [#allocation3], 4294967168 }
0x1347   :  { %1749 = vsyncpa [#allocation3], 1 }

</bundles_post_ra>
